<compile_context>
chip_gen: v7x
topology: tpu7x:2x2x1
jax: 0.10.0
libtpu: 0.0.40
codegen_flags: <defaults>
</compile_context>

<pallas_src>
import functools

import jax
import jax.numpy as jnp
from jax import lax
from jax.experimental import pallas as pl
from jax.experimental.pallas import tpu as pltpu


# ----------------------------------------------------------------------------- helpers
def _round_up(n, m):
    return (n + m - 1) // m * m


def _pick_tile(n, cap, align):
    """Largest tile <= cap that divides n and is a multiple of `align`.
    Falls back to `cap` (the grid then uses cdiv; Pallas masks the ragged tail)."""
    if n <= cap:
        return n
    for t in range(cap - cap % align, align - 1, -align):
        if n % t == 0:
            return t
    return cap


def _pick_divisor(n, cap):
    """Largest divisor of n that is <= cap (always exists: 1)."""
    if n <= cap:
        return n
    for t in range(cap, 0, -1):
        if n % t == 0:
            return t
    return n


def _fold_bn(bn, eps=1e-5):
    """Inference BatchNorm folded to per-channel (scale, shift), both (1, C) f32."""
    scale = bn["gamma"] * lax.rsqrt(bn["var"] + eps)
    shift = bn["beta"] - bn["mean"] * scale
    return (scale.reshape(1, -1).astype(jnp.float32),
            shift.reshape(1, -1).astype(jnp.float32))


# ------------------------------------------------- 1x1 conv == matmul (+BN, +add, +ReLU)
def _matmul_bn_kernel(*refs, has_residual, relu):
    if has_residual:
        x_ref, w_ref, scale_ref, shift_ref, res_ref, o_ref = refs
    else:
        x_ref, w_ref, scale_ref, shift_ref, o_ref = refs
        res_ref = None
    r = jnp.dot(x_ref[...], w_ref[...], preferred_element_type=jnp.float32)
    r = r * scale_ref[...] + shift_ref[...]
    if has_residual:
        r = r + res_ref[...].astype(jnp.float32)
    if relu:
        r = jnp.maximum(r, 0.0)
    o_ref[...] = r.astype(o_ref.dtype)


def matmul_bn(x, w, scale, shift, residual=None, *, relu, out_dtype):
    """bf16 (M,K)@(K,N) + fused per-channel scale/shift (+residual add)(+ReLU).
    The full weight stays VMEM-resident; grid only tiles M (no K reduction axis)."""
    M, K = x.shape
    N = w.shape[1]
    tm = _pick_tile(M, 256, 16)              # 16-aligned: bf16 packs 16 sublanes / vreg
    has_res = residual is not None

    in_specs = [
        pl.BlockSpec((tm, K), lambda i: (i, 0)),
        pl.BlockSpec((K, N), lambda i: (0, 0)),      # resident weight (<= a few MiB)
        pl.BlockSpec((1, N), lambda i: (0, 0)),
        pl.BlockSpec((1, N), lambda i: (0, 0)),
    ]
    args = [x.astype(jnp.bfloat16), w.astype(jnp.bfloat16), scale, shift]
    if has_res:
        in_specs.append(pl.BlockSpec((tm, N), lambda i: (i, 0)))
        args.append(residual.astype(jnp.bfloat16))

    kernel = functools.partial(_matmul_bn_kernel, has_residual=has_res, relu=relu)
    return pl.pallas_call(
        kernel,
        out_shape=jax.ShapeDtypeStruct((M, N), out_dtype),
        grid=(pl.cdiv(M, tm),),
        in_specs=in_specs,
        out_specs=pl.BlockSpec((tm, N), lambda i: (i, 0)),
        compiler_params=pltpu.CompilerParams(dimension_semantics=("parallel",)),
    )(*args)


# ----------------------------------------------------------------- 3x3 conv + BN + ReLU
def _conv_taps_kernel(x_ref, w_ref, scale_ref, shift_ref, o_ref, *, KH, KW, th, Wout, Wpad):
    """Valid KHxKW conv over a flattened (rows, Wpad) row tile.
    x_ref: (1, (th+KH)*Wpad, Ck) bf16, w_ref: (KH*KW, Ck, Cout) bf16,
    scale/shift: (1, Cout) f32, o_ref: (1, th, Wout, Cout) bf16."""
    xf = x_ref[0]                                   # ((th+KH)*Wpad, Ck)
    M = th * Wpad
    Lv = (th + KH - 1) * Wpad
    acc = None
    for kx in range(KW):
        # Hoist the (sublane-misaligned) column shift: one shifted copy per kx; every
        # row-tap slice below then starts at a multiple of Wpad (multiple of 8).
        xs = xf if kx == 0 else xf[kx:kx + Lv, :]
        for ky in range(KH):
            tap = jnp.dot(xs[ky * Wpad: ky * Wpad + M, :], w_ref[ky * KW + kx],
                          preferred_element_type=jnp.float32)
            acc = tap if acc is None else acc + tap
    r = acc * scale_ref[...] + shift_ref[...]
    r = jnp.maximum(r, 0.0)
    r = r.reshape(th, Wpad, -1)[:, :Wout, :]        # drop padded/garbage columns in VMEM
    o_ref[0] = r.astype(o_ref.dtype)


def conv3x3_bn_relu(x, w, scale, shift, *, stride):
    """3x3 conv (pad 1, given stride) + folded BN + ReLU.  Output is bf16 NHWC."""
    B, H, W, Cin = x.shape
    Cout = w.shape[-1]
    x = x.astype(jnp.bfloat16)

    if stride == 1:
        Hout, Wout = H, W
        KH = KW = 3
        Ck = Cin
        Wpad = _round_up(W + 2, 8)
        # rows [-1 .. H+1]: 1 top halo, 1 bottom halo, +1 slack row for the kx shifts
        img = jnp.pad(x, ((0, 0), (1, 2), (1, Wpad - W - 1), (0, 0)))
        wk = w.reshape(9, Cin, Cout).astype(jnp.bfloat16)
    elif stride == 2:
        # space-to-depth: stride-2 3x3/pad-1 conv == valid 2x2 conv over 2x2 input cells
        # with 4*Cin channels (7 of the 16 phase weights are zero).
        Hout, Wout = -(-H // 2), -(-W // 2)
        KH = KW = 2
        Ck = 4 * Cin
        Hp2, Wp2 = 2 * Hout + 2, 2 * Wout + 2        # input coords [-1 .. 2*Hout/2*Wout]
        xp = jnp.pad(x, ((0, 0), (1, Hp2 - H - 1), (1, Wp2 - W - 1), (0, 0)))
        cells = xp.reshape(B, Hout + 1, 2, Wout + 1, 2, Cin)
        cells = cells.transpose(0, 1, 3, 2, 4, 5).reshape(B, Hout + 1, Wout + 1, Ck)
        Wpad = _round_up(Wout + 1, 8)
        # +1 slack cell-row at the bottom for the kx shifts; zero-pad cell columns to Wpad
        img = jnp.pad(cells, ((0, 0), (0, 1), (0, Wpad - (Wout + 1)), (0, 0)))
        wk = jnp.zeros((4, Ck, Cout), jnp.float32)
        for ky in range(2):
            for kx in range(2):
                for pr in range(2):
                    for pc in range(2):
                        a, b = 2 * ky + pr, 2 * kx + pc
                        if a < 3 and b < 3:
                            c0 = (pr * 2 + pc) * Cin
                            wk = wk.at[2 * ky + kx, c0:c0 + Cin, :].set(w[a, b])
        wk = wk.astype(jnp.bfloat16)
    else:
        # TODO(synk): strides > 2 fall back to exact stride-1 compute + subsample.
        y = conv3x3_bn_relu(x, w, scale, shift, stride=1)
        return y[:, ::stride, ::stride, :]

    # Row-tile with halo duplication: (B, Hout+KH, Wpad, Ck) -> (B*T, (th+KH)*Wpad, Ck)
    th = _pick_divisor(Hout, 8)
    T = Hout // th
    rows_in = th + KH                       # th output rows need th+KH-1 rows (+1 slack)
    tiles = jnp.stack([img[:, t * th: t * th + rows_in] for t in range(T)], axis=1)
    xt = tiles.reshape(B * T, rows_in * Wpad, Ck)

    kernel = functools.partial(_conv_taps_kernel, KH=KH, KW=KW, th=th, Wout=Wout, Wpad=Wpad)
    y = pl.pallas_call(
        kernel,
        out_shape=jax.ShapeDtypeStruct((B * T, th, Wout, Cout), jnp.bfloat16),
        grid=(B * T,),
        in_specs=[
            pl.BlockSpec((1, rows_in * Wpad, Ck), lambda i: (i, 0, 0)),
            pl.BlockSpec((KH * KW, Ck, Cout), lambda i: (0, 0, 0)),
            pl.BlockSpec((1, Cout), lambda i: (0, 0)),
            pl.BlockSpec((1, Cout), lambda i: (0, 0)),
        ],
        out_specs=pl.BlockSpec((1, th, Wout, Cout), lambda i: (i, 0, 0, 0)),
        compiler_params=pltpu.CompilerParams(dimension_semantics=("parallel",)),
    )(xt, wk, scale, shift)
    return y.reshape(B, Hout, Wout, Cout)


# ------------------------------------------------------------------------------- model
def init_params(key, in_channels, out_channels, stride, expansion=4):
    cm, ce = out_channels, out_channels * expansion
    ks = jax.random.split(key, 8)

    def he(k, shape, fan_in):
        return jax.random.normal(k, shape, jnp.float32) * (2.0 / fan_in) ** 0.5

    def bn(k, c):
        k1, k2, k3, k4 = jax.random.split(k, 4)
        return dict(gamma=1.0 + 0.1 * jax.random.normal(k1, (c,), jnp.float32),
                    beta=0.1 * jax.random.normal(k2, (c,), jnp.float32),
                    mean=0.1 * jax.random.normal(k3, (c,), jnp.float32),
                    var=0.5 + jax.random.uniform(k4, (c,), jnp.float32))

    p = {"w1": he(ks[0], (in_channels, cm), in_channels), "bn1": bn(ks[1], cm),
         "w2": he(ks[2], (3, 3, cm, cm), 9 * cm),         "bn2": bn(ks[3], cm),
         "w3": he(ks[4], (cm, ce), cm),                   "bn3": bn(ks[5], ce)}
    if stride != 1 or in_channels != ce:
        p["ws"] = he(ks[6], (in_channels, ce), in_channels)
        p["bns"] = bn(ks[7], ce)
    return p


def bottleneck_forward(params, x_nchw, *, stride):
    x = jnp.transpose(x_nchw, (0, 2, 3, 1))                  # NCHW -> NHWC
    B, H, W, Cin = x.shape
    Cm = params["w1"].shape[1]
    Ce = params["w3"].shape[1]

    # shortcut branch (bf16 intermediate)
    if "ws" in params:
        xs = x[:, ::stride, ::stride, :]                     # strided 1x1 conv == subsample
        Hs, Ws = xs.shape[1], xs.shape[2]
        short = matmul_bn(xs.reshape(-1, Cin), params["ws"], *_fold_bn(params["bns"]),
                          relu=False, out_dtype=jnp.bfloat16)
    else:
        Hs, Ws = H, W
        short = x.reshape(-1, Cin).astype(jnp.bfloat16)      # identity shortcut

    # residual function
    h = matmul_bn(x.reshape(-1, Cin), params["w1"], *_fold_bn(params["bn1"]),
                  relu=True, out_dtype=jnp.bfloat16)
    h = conv3x3_bn_relu(h.reshape(B, H, W, Cm), params["w2"],
                        *_fold_bn(params["bn2"]), stride=stride)        # (B, Hs, Ws, Cm) bf16
    out = matmul_bn(h.reshape(-1, Cm), params["w3"], *_fold_bn(params["bn3"]),
                    residual=short, relu=True, out_dtype=jnp.float32)
    return jnp.transpose(out.reshape(B, Hs, Ws, Ce), (0, 3, 1, 2))      # NHWC -> NCHW


# --------------------------------------------------------------------- pure-JAX reference
def reference_forward(params, x_nchw, *, stride):
    """Mirrors the kernels' precision choices (bf16 matmul operands / bf16 intermediates,
    f32 accumulation and epilogues)."""
    x = jnp.transpose(x_nchw, (0, 2, 3, 1))
    q = lambda a: a.astype(jnp.bfloat16)
    f32 = lambda a: a.astype(jnp.float32)

    def bn(h, p):
        s, b = _fold_bn(p)
        return h * s.reshape(1, 1, 1, -1) + b.reshape(1, 1, 1, -1)

    def conv1x1(h, w, s=1):
        if s != 1:
            h = h[:, ::s, ::s, :]
        B, H, W, C = h.shape
        y = jnp.dot(f32(q(h)).reshape(-1, C), f32(q(w)), precision=lax.Precision.HIGHEST)
        return y.reshape(B, H, W, -1)

    def conv3x3(h, w, s):
        return lax.conv_general_dilated(f32(q(h)), f32(q(w)), (s, s), ((1, 1), (1, 1)),
                                        dimension_numbers=("NHWC", "HWIO", "NHWC"),
                                        precision=lax.Precision.HIGHEST)

    short = q(bn(conv1x1(x, params["ws"], stride), params["bns"])) if "ws" in params else q(x)
    h = q(jnp.maximum(bn(conv1x1(x, params["w1"]), params["bn1"]), 0.0))
    h = q(jnp.maximum(bn(conv3x3(h, params["w2"], stride), params["bn2"]), 0.0))
    h = bn(conv1x1(h, params["w3"]), params["bn3"])
    return jnp.transpose(jnp.maximum(h + f32(short), 0.0), (0, 3, 1, 2))


if __name__ == "__main__":
    key = jax.random.PRNGKey(0)
    B, H, W = 2, 16, 16
    configs = [
        (64, 16, 2),   # projection shortcut (stride 2 + channel change) -> s2d conv path
        (64, 16, 1),   # identity shortcut (stride 1, in_channels == out_channels * 4)
    ]
    for (cin, cout, stride) in configs:
        key, kp, kx = jax.random.split(key, 3)
        params = init_params(kp, cin, cout, stride)
        x = jax.random.normal(kx, (B, cin, H, W), jnp.float32)
        fwd = jax.jit(functools.partial(bottleneck_forward, stride=stride))
        out = jax.block_until_ready(fwd(params, x))
        Ho, Wo = (H + stride - 1) // stride, (W + stride - 1) // stride
        assert out.shape == (B, cout * 4, Ho, Wo) and out.dtype == jnp.float32
        ref = reference_forward(params, x, stride=stride)
        err = float(jnp.max(jnp.abs(out - ref)))
        assert err < 2e-2, f"mismatch vs reference (stride={stride}): {err}"
    print("KERNEL_OK")
</pallas_src>

<mosaic_0001>
module attributes {stable_mosaic.version = 11 : i64} {
  func.func @_matmul_bn_kernel(%arg0: i32, %arg1: memref<256x64xbf16, #tpu.memory_space<vmem>>, %arg2: memref<64x16xbf16, #tpu.memory_space<vmem>>, %arg3: memref<1x16xf32, #tpu.memory_space<vmem>>, %arg4: memref<1x16xf32, #tpu.memory_space<vmem>>, %arg5: memref<256x16xbf16, #tpu.memory_space<vmem>>) attributes {dimension_semantics = [#tpu.dimension_semantics<parallel>], iteration_bounds = array<i64: 2>, scalar_prefetch = 0 : i64, scratch_operands = 0 : i64, tpu.core_type = #tpu.core_type<tc>, window_params = [{transform_indices = @transform_0, window_bounds = array<i64: 256, 64>}, {pipeline_mode = #tpu.pipeline_mode<synchronous>, transform_indices = @transform_1, window_bounds = array<i64: 64, 16>}, {pipeline_mode = #tpu.pipeline_mode<synchronous>, transform_indices = @transform_2, window_bounds = array<i64: 1, 16>}, {pipeline_mode = #tpu.pipeline_mode<synchronous>, transform_indices = @transform_3, window_bounds = array<i64: 1, 16>}, {transform_indices = @transform_4, window_bounds = array<i64: 256, 16>}]} {
    %c0 = arith.constant 0 : index
    %c0_0 = arith.constant 0 : index
    %0 = vector.load %arg1[%c0, %c0_0] : memref<256x64xbf16, #tpu.memory_space<vmem>>, vector<256x64xbf16>
    %c0_1 = arith.constant 0 : index
    %c0_2 = arith.constant 0 : index
    %1 = vector.load %arg2[%c0_1, %c0_2] : memref<64x16xbf16, #tpu.memory_space<vmem>>, vector<64x16xbf16>
    %cst = arith.constant dense<0.000000e+00> : vector<256x16xf32>
    %2 = tpu.matmul %0, %1, %cst {dimension_numbers = #tpu.dot_dimension_numbers<[1], [0], [0], [1], [0, 0, 1, 1], [], []>} : vector<256x64xbf16>, vector<64x16xbf16>, vector<256x16xf32> -> vector<256x16xf32>
    %c0_3 = arith.constant 0 : index
    %c0_4 = arith.constant 0 : index
    %3 = vector.load %arg3[%c0_3, %c0_4] : memref<1x16xf32, #tpu.memory_space<vmem>>, vector<1x16xf32>
    %4 = vector.broadcast %3 : vector<1x16xf32> to vector<256x16xf32>
    %5 = arith.mulf %2, %4 : vector<256x16xf32>
    %c0_5 = arith.constant 0 : index
    %c0_6 = arith.constant 0 : index
    %6 = vector.load %arg4[%c0_5, %c0_6] : memref<1x16xf32, #tpu.memory_space<vmem>>, vector<1x16xf32>
    %7 = vector.broadcast %6 : vector<1x16xf32> to vector<256x16xf32>
    %8 = arith.addf %5, %7 : vector<256x16xf32>
    %cst_7 = arith.constant 0.000000e+00 : f32
    %9 = vector.broadcast %cst_7 : f32 to vector<256x16xf32>
    %10 = arith.maximumf %8, %9 : vector<256x16xf32>
    %11 = arith.truncf %10 : vector<256x16xf32> to vector<256x16xbf16>
    %c0_8 = arith.constant 0 : index
    %c0_9 = arith.constant 0 : index
    %12 = vector.load %arg5[%c0_8, %c0_9] : memref<256x16xbf16, #tpu.memory_space<vmem>>, vector<256x16xbf16>
    tpu.vector_store %arg5[%c0_8, %c0_9], %11 {strides = array<i32>} : memref<256x16xbf16, #tpu.memory_space<vmem>>, vector<256x16xbf16>,
    return
  }
  func.func @transform_0(%arg0: i32) -> (i32, i32) {
    %c0_i32 = arith.constant 0 : i32
    %c0_i32_0 = arith.constant 0 : i32
    return %arg0, %c0_i32 : i32, i32
  }
  func.func @transform_1(%arg0: i32) -> (i32, i32) {
    %c0_i32 = arith.constant 0 : i32
    %c0_i32_0 = arith.constant 0 : i32
    %c0_i32_1 = arith.constant 0 : i32
    return %c0_i32, %c0_i32_0 : i32, i32
  }
  func.func @transform_2(%arg0: i32) -> (i32, i32) {
    %c0_i32 = arith.constant 0 : i32
    %c0_i32_0 = arith.constant 0 : i32
    %c0_i32_1 = arith.constant 0 : i32
    return %c0_i32, %c0_i32_0 : i32, i32
  }
  func.func @transform_3(%arg0: i32) -> (i32, i32) {
    %c0_i32 = arith.constant 0 : i32
    %c0_i32_0 = arith.constant 0 : i32
    %c0_i32_1 = arith.constant 0 : i32
    return %c0_i32, %c0_i32_0 : i32, i32
  }
  func.func @transform_4(%arg0: i32) -> (i32, i32) {
    %c0_i32 = arith.constant 0 : i32
    %c0_i32_0 = arith.constant 0 : i32
    return %arg0, %c0_i32 : i32, i32
  }
}

module attributes {stable_mosaic.version = 11 : i64} {
  func.func @_conv_taps_kernel(%arg0: i32, %arg1: memref<1x160x64xbf16, #tpu.memory_space<vmem>>, %arg2: memref<4x64x16xbf16, #tpu.memory_space<vmem>>, %arg3: memref<1x16xf32, #tpu.memory_space<vmem>>, %arg4: memref<1x16xf32, #tpu.memory_space<vmem>>, %arg5: memref<1x8x8x16xbf16, #tpu.memory_space<vmem>>) attributes {dimension_semantics = [#tpu.dimension_semantics<parallel>], iteration_bounds = array<i64: 2>, scalar_prefetch = 0 : i64, scratch_operands = 0 : i64, tpu.core_type = #tpu.core_type<tc>, window_params = [{transform_indices = @transform_0, window_bounds = array<i64: 1, 160, 64>}, {pipeline_mode = #tpu.pipeline_mode<synchronous>, transform_indices = @transform_1, window_bounds = array<i64: 4, 64, 16>}, {pipeline_mode = #tpu.pipeline_mode<synchronous>, transform_indices = @transform_2, window_bounds = array<i64: 1, 16>}, {pipeline_mode = #tpu.pipeline_mode<synchronous>, transform_indices = @transform_3, window_bounds = array<i64: 1, 16>}, {transform_indices = @transform_4, window_bounds = array<i64: 1, 8, 8, 16>}]} {
    %c0 = arith.constant 0 : index
    %c0_0 = arith.constant 0 : index
    %c0_1 = arith.constant 0 : index
    %0 = vector.load %arg1[%c0, %c0_0, %c0_1] : memref<1x160x64xbf16, #tpu.memory_space<vmem>>, vector<1x160x64xbf16>
    %1 = vector.shape_cast %0 : vector<1x160x64xbf16> to vector<160x64xbf16>
    %2 = vector.extract_strided_slice %1 {offsets = [0, 0], sizes = [128, 64], strides = [1, 1]} : vector<160x64xbf16> to vector<128x64xbf16>
    %c0_2 = arith.constant 0 : index
    %c0_3 = arith.constant 0 : index
    %c0_4 = arith.constant 0 : index
    %3 = vector.load %arg2[%c0_2, %c0_3, %c0_4] : memref<4x64x16xbf16, #tpu.memory_space<vmem>>, vector<1x64x16xbf16>
    %4 = vector.shape_cast %3 : vector<1x64x16xbf16> to vector<64x16xbf16>
    %cst = arith.constant dense<0.000000e+00> : vector<128x16xf32>
    %5 = tpu.matmul %2, %4, %cst {dimension_numbers = #tpu.dot_dimension_numbers<[1], [0], [0], [1], [0, 0, 1, 1], [], []>} : vector<128x64xbf16>, vector<64x16xbf16>, vector<128x16xf32> -> vector<128x16xf32>
    %6 = vector.extract_strided_slice %1 {offsets = [16, 0], sizes = [128, 64], strides = [1, 1]} : vector<160x64xbf16> to vector<128x64xbf16>
    %c2 = arith.constant 2 : index
    %c0_5 = arith.constant 0 : index
    %c0_6 = arith.constant 0 : index
    %7 = vector.load %arg2[%c2, %c0_5, %c0_6] : memref<4x64x16xbf16, #tpu.memory_space<vmem>>, vector<1x64x16xbf16>
    %8 = vector.shape_cast %7 : vector<1x64x16xbf16> to vector<64x16xbf16>
    %cst_7 = arith.constant dense<0.000000e+00> : vector<128x16xf32>
    %9 = tpu.matmul %6, %8, %cst_7 {dimension_numbers = #tpu.dot_dimension_numbers<[1], [0], [0], [1], [0, 0, 1, 1], [], []>} : vector<128x64xbf16>, vector<64x16xbf16>, vector<128x16xf32> -> vector<128x16xf32>
    %10 = arith.addf %5, %9 : vector<128x16xf32>
    %11 = vector.extract_strided_slice %1 {offsets = [1, 0], sizes = [144, 64], strides = [1, 1]} : vector<160x64xbf16> to vector<144x64xbf16>
    %12 = vector.extract_strided_slice %11 {offsets = [0, 0], sizes = [128, 64], strides = [1, 1]} : vector<144x64xbf16> to vector<128x64xbf16>
    %c1 = arith.constant 1 : index
    %c0_8 = arith.constant 0 : index
    %c0_9 = arith.constant 0 : index
    %13 = vector.load %arg2[%c1, %c0_8, %c0_9] : memref<4x64x16xbf16, #tpu.memory_space<vmem>>, vector<1x64x16xbf16>
    %14 = vector.shape_cast %13 : vector<1x64x16xbf16> to vector<64x16xbf16>
    %cst_10 = arith.constant dense<0.000000e+00> : vector<128x16xf32>
    %15 = tpu.matmul %12, %14, %cst_10 {dimension_numbers = #tpu.dot_dimension_numbers<[1], [0], [0], [1], [0, 0, 1, 1], [], []>} : vector<128x64xbf16>, vector<64x16xbf16>, vector<128x16xf32> -> vector<128x16xf32>
    %16 = arith.addf %10, %15 : vector<128x16xf32>
    %17 = vector.extract_strided_slice %11 {offsets = [16, 0], sizes = [128, 64], strides = [1, 1]} : vector<144x64xbf16> to vector<128x64xbf16>
    %c3 = arith.constant 3 : index
    %c0_11 = arith.constant 0 : index
    %c0_12 = arith.constant 0 : index
    %18 = vector.load %arg2[%c3, %c0_11, %c0_12] : memref<4x64x16xbf16, #tpu.memory_space<vmem>>, vector<1x64x16xbf16>
    %19 = vector.shape_cast %18 : vector<1x64x16xbf16> to vector<64x16xbf16>
    %cst_13 = arith.constant dense<0.000000e+00> : vector<128x16xf32>
    %20 = tpu.matmul %17, %19, %cst_13 {dimension_numbers = #tpu.dot_dimension_numbers<[1], [0], [0], [1], [0, 0, 1, 1], [], []>} : vector<128x64xbf16>, vector<64x16xbf16>, vector<128x16xf32> -> vector<128x16xf32>
    %21 = arith.addf %16, %20 : vector<128x16xf32>
    %c0_14 = arith.constant 0 : index
    %c0_15 = arith.constant 0 : index
    %22 = vector.load %arg3[%c0_14, %c0_15] : memref<1x16xf32, #tpu.memory_space<vmem>>, vector<1x16xf32>
    %23 = vector.broadcast %22 : vector<1x16xf32> to vector<128x16xf32>
    %24 = arith.mulf %21, %23 : vector<128x16xf32>
    %c0_16 = arith.constant 0 : index
    %c0_17 = arith.constant 0 : index
    %25 = vector.load %arg4[%c0_16, %c0_17] : memref<1x16xf32, #tpu.memory_space<vmem>>, vector<1x16xf32>
    %26 = vector.broadcast %25 : vector<1x16xf32> to vector<128x16xf32>
    %27 = arith.addf %24, %26 : vector<128x16xf32>
    %cst_18 = arith.constant 0.000000e+00 : f32
    %28 = vector.broadcast %cst_18 : f32 to vector<128x16xf32>
    %29 = arith.maximumf %27, %28 : vector<128x16xf32>
    %30 = vector.shape_cast %29 : vector<128x16xf32> to vector<8x16x16xf32>
    %31 = vector.extract_strided_slice %30 {offsets = [0, 0, 0], sizes = [8, 8, 16], strides = [1, 1, 1]} : vector<8x16x16xf32> to vector<8x8x16xf32>
    %32 = arith.truncf %31 : vector<8x8x16xf32> to vector<8x8x16xbf16>
    %c0_19 = arith.constant 0 : index
    %c0_20 = arith.constant 0 : index
    %c0_21 = arith.constant 0 : index
    %c0_22 = arith.constant 0 : index
    %33 = vector.load %arg5[%c0_19, %c0_20, %c0_21, %c0_22] : memref<1x8x8x16xbf16, #tpu.memory_space<vmem>>, vector<1x8x8x16xbf16>
    %34 = vector.shape_cast %33 : vector<1x8x8x16xbf16> to vector<8x8x16xbf16>
    %35 = vector.shape_cast %32 : vector<8x8x16xbf16> to vector<1x8x8x16xbf16>
    tpu.vector_store %arg5[%c0_19, %c0_20, %c0_21, %c0_22], %35 {strides = array<i32>} : memref<1x8x8x16xbf16, #tpu.memory_space<vmem>>, vector<1x8x8x16xbf16>,
    return
  }
  func.func @transform_0(%arg0: i32) -> (i32, i32, i32) {
    %c0_i32 = arith.constant 0 : i32
    %c0_i32_0 = arith.constant 0 : i32
    %c0_i32_1 = arith.constant 0 : i32
    return %arg0, %c0_i32, %c0_i32_0 : i32, i32, i32
  }
  func.func @transform_1(%arg0: i32) -> (i32, i32, i32) {
    %c0_i32 = arith.constant 0 : i32
    %c0_i32_0 = arith.constant 0 : i32
    %c0_i32_1 = arith.constant 0 : i32
    %c0_i32_2 = arith.constant 0 : i32
    return %c0_i32, %c0_i32_0, %c0_i32_1 : i32, i32, i32
  }
  func.func @transform_2(%arg0: i32) -> (i32, i32) {
    %c0_i32 = arith.constant 0 : i32
    %c0_i32_0 = arith.constant 0 : i32
    %c0_i32_1 = arith.constant 0 : i32
    return %c0_i32, %c0_i32_0 : i32, i32
  }
  func.func @transform_3(%arg0: i32) -> (i32, i32) {
    %c0_i32 = arith.constant 0 : i32
    %c0_i32_0 = arith.constant 0 : i32
    %c0_i32_1 = arith.constant 0 : i32
    return %c0_i32, %c0_i32_0 : i32, i32
  }
  func.func @transform_4(%arg0: i32) -> (i32, i32, i32, i32) {
    %c0_i32 = arith.constant 0 : i32
    %c0_i32_0 = arith.constant 0 : i32
    %c0_i32_1 = arith.constant 0 : i32
    %c0_i32_2 = arith.constant 0 : i32
    return %arg0, %c0_i32, %c0_i32_0, %c0_i32_1 : i32, i32, i32, i32
  }
}

module attributes {stable_mosaic.version = 11 : i64} {
  func.func @_matmul_bn_kernel(%arg0: i32, %arg1: memref<128x16xbf16, #tpu.memory_space<vmem>>, %arg2: memref<16x64xbf16, #tpu.memory_space<vmem>>, %arg3: memref<1x64xf32, #tpu.memory_space<vmem>>, %arg4: memref<1x64xf32, #tpu.memory_space<vmem>>, %arg5: memref<128x64xbf16, #tpu.memory_space<vmem>>, %arg6: memref<128x64xf32, #tpu.memory_space<vmem>>) attributes {dimension_semantics = [#tpu.dimension_semantics<parallel>], iteration_bounds = array<i64: 1>, scalar_prefetch = 0 : i64, scratch_operands = 0 : i64, tpu.core_type = #tpu.core_type<tc>, window_params = [{transform_indices = @transform_0, window_bounds = array<i64: 128, 16>}, {pipeline_mode = #tpu.pipeline_mode<synchronous>, transform_indices = @transform_1, window_bounds = array<i64: 16, 64>}, {pipeline_mode = #tpu.pipeline_mode<synchronous>, transform_indices = @transform_2, window_bounds = array<i64: 1, 64>}, {pipeline_mode = #tpu.pipeline_mode<synchronous>, transform_indices = @transform_3, window_bounds = array<i64: 1, 64>}, {transform_indices = @transform_4, window_bounds = array<i64: 128, 64>}, {transform_indices = @transform_5, window_bounds = array<i64: 128, 64>}]} {
    %c0 = arith.constant 0 : index
    %c0_0 = arith.constant 0 : index
    %0 = vector.load %arg1[%c0, %c0_0] : memref<128x16xbf16, #tpu.memory_space<vmem>>, vector<128x16xbf16>
    %c0_1 = arith.constant 0 : index
    %c0_2 = arith.constant 0 : index
    %1 = vector.load %arg2[%c0_1, %c0_2] : memref<16x64xbf16, #tpu.memory_space<vmem>>, vector<16x64xbf16>
    %cst = arith.constant dense<0.000000e+00> : vector<128x64xf32>
    %2 = tpu.matmul %0, %1, %cst {dimension_numbers = #tpu.dot_dimension_numbers<[1], [0], [0], [1], [0, 0, 1, 1], [], []>} : vector<128x16xbf16>, vector<16x64xbf16>, vector<128x64xf32> -> vector<128x64xf32>
    %c0_3 = arith.constant 0 : index
    %c0_4 = arith.constant 0 : index
    %3 = vector.load %arg3[%c0_3, %c0_4] : memref<1x64xf32, #tpu.memory_space<vmem>>, vector<1x64xf32>
    %4 = vector.broadcast %3 : vector<1x64xf32> to vector<128x64xf32>
    %5 = arith.mulf %2, %4 : vector<128x64xf32>
    %c0_5 = arith.constant 0 : index
    %c0_6 = arith.constant 0 : index
    %6 = vector.load %arg4[%c0_5, %c0_6] : memref<1x64xf32, #tpu.memory_space<vmem>>, vector<1x64xf32>
    %7 = vector.broadcast %6 : vector<1x64xf32> to vector<128x64xf32>
    %8 = arith.addf %5, %7 : vector<128x64xf32>
    %c0_7 = arith.constant 0 : index
    %c0_8 = arith.constant 0 : index
    %9 = vector.load %arg5[%c0_7, %c0_8] : memref<128x64xbf16, #tpu.memory_space<vmem>>, vector<128x64xbf16>
    %10 = arith.extf %9 : vector<128x64xbf16> to vector<128x64xf32>
    %11 = arith.addf %8, %10 : vector<128x64xf32>
    %cst_9 = arith.constant 0.000000e+00 : f32
    %12 = vector.broadcast %cst_9 : f32 to vector<128x64xf32>
    %13 = arith.maximumf %11, %12 : vector<128x64xf32>
    %c0_10 = arith.constant 0 : index
    %c0_11 = arith.constant 0 : index
    %14 = vector.load %arg6[%c0_10, %c0_11] : memref<128x64xf32, #tpu.memory_space<vmem>>, vector<128x64xf32>
    tpu.vector_store %arg6[%c0_10, %c0_11], %13 {strides = array<i32>} : memref<128x64xf32, #tpu.memory_space<vmem>>, vector<128x64xf32>,
    return
  }
  func.func @transform_0(%arg0: i32) -> (i32, i32) {
    %c0_i32 = arith.constant 0 : i32
    %c0_i32_0 = arith.constant 0 : i32
    return %arg0, %c0_i32 : i32, i32
  }
  func.func @transform_1(%arg0: i32) -> (i32, i32) {
    %c0_i32 = arith.constant 0 : i32
    %c0_i32_0 = arith.constant 0 : i32
    %c0_i32_1 = arith.constant 0 : i32
    return %c0_i32, %c0_i32_0 : i32, i32
  }
  func.func @transform_2(%arg0: i32) -> (i32, i32) {
    %c0_i32 = arith.constant 0 : i32
    %c0_i32_0 = arith.constant 0 : i32
    %c0_i32_1 = arith.constant 0 : i32
    return %c0_i32, %c0_i32_0 : i32, i32
  }
  func.func @transform_3(%arg0: i32) -> (i32, i32) {
    %c0_i32 = arith.constant 0 : i32
    %c0_i32_0 = arith.constant 0 : i32
    %c0_i32_1 = arith.constant 0 : i32
    return %c0_i32, %c0_i32_0 : i32, i32
  }
  func.func @transform_4(%arg0: i32) -> (i32, i32) {
    %c0_i32 = arith.constant 0 : i32
    %c0_i32_0 = arith.constant 0 : i32
    return %arg0, %c0_i32 : i32, i32
  }
  func.func @transform_5(%arg0: i32) -> (i32, i32) {
    %c0_i32 = arith.constant 0 : i32
    %c0_i32_0 = arith.constant 0 : i32
    return %arg0, %c0_i32 : i32, i32
  }
}

module attributes {stable_mosaic.version = 11 : i64} {
  func.func @_matmul_bn_kernel(%arg0: i32, %arg1: memref<128x64xbf16, #tpu.memory_space<vmem>>, %arg2: memref<64x64xbf16, #tpu.memory_space<vmem>>, %arg3: memref<1x64xf32, #tpu.memory_space<vmem>>, %arg4: memref<1x64xf32, #tpu.memory_space<vmem>>, %arg5: memref<128x64xbf16, #tpu.memory_space<vmem>>) attributes {dimension_semantics = [#tpu.dimension_semantics<parallel>], iteration_bounds = array<i64: 1>, scalar_prefetch = 0 : i64, scratch_operands = 0 : i64, tpu.core_type = #tpu.core_type<tc>, window_params = [{transform_indices = @transform_0, window_bounds = array<i64: 128, 64>}, {pipeline_mode = #tpu.pipeline_mode<synchronous>, transform_indices = @transform_1, window_bounds = array<i64: 64, 64>}, {pipeline_mode = #tpu.pipeline_mode<synchronous>, transform_indices = @transform_2, window_bounds = array<i64: 1, 64>}, {pipeline_mode = #tpu.pipeline_mode<synchronous>, transform_indices = @transform_3, window_bounds = array<i64: 1, 64>}, {transform_indices = @transform_4, window_bounds = array<i64: 128, 64>}]} {
    %c0 = arith.constant 0 : index
    %c0_0 = arith.constant 0 : index
    %0 = vector.load %arg1[%c0, %c0_0] : memref<128x64xbf16, #tpu.memory_space<vmem>>, vector<128x64xbf16>
    %c0_1 = arith.constant 0 : index
    %c0_2 = arith.constant 0 : index
    %1 = vector.load %arg2[%c0_1, %c0_2] : memref<64x64xbf16, #tpu.memory_space<vmem>>, vector<64x64xbf16>
    %cst = arith.constant dense<0.000000e+00> : vector<128x64xf32>
    %2 = tpu.matmul %0, %1, %cst {dimension_numbers = #tpu.dot_dimension_numbers<[1], [0], [0], [1], [0, 0, 1, 1], [], []>} : vector<128x64xbf16>, vector<64x64xbf16>, vector<128x64xf32> -> vector<128x64xf32>
    %c0_3 = arith.constant 0 : index
    %c0_4 = arith.constant 0 : index
    %3 = vector.load %arg3[%c0_3, %c0_4] : memref<1x64xf32, #tpu.memory_space<vmem>>, vector<1x64xf32>
    %4 = vector.broadcast %3 : vector<1x64xf32> to vector<128x64xf32>
    %5 = arith.mulf %2, %4 : vector<128x64xf32>
    %c0_5 = arith.constant 0 : index
    %c0_6 = arith.constant 0 : index
    %6 = vector.load %arg4[%c0_5, %c0_6] : memref<1x64xf32, #tpu.memory_space<vmem>>, vector<1x64xf32>
    %7 = vector.broadcast %6 : vector<1x64xf32> to vector<128x64xf32>
    %8 = arith.addf %5, %7 : vector<128x64xf32>
    %9 = arith.truncf %8 : vector<128x64xf32> to vector<128x64xbf16>
    %c0_7 = arith.constant 0 : index
    %c0_8 = arith.constant 0 : index
    %10 = vector.load %arg5[%c0_7, %c0_8] : memref<128x64xbf16, #tpu.memory_space<vmem>>, vector<128x64xbf16>
    tpu.vector_store %arg5[%c0_7, %c0_8], %9 {strides = array<i32>} : memref<128x64xbf16, #tpu.memory_space<vmem>>, vector<128x64xbf16>,
    return
  }
  func.func @transform_0(%arg0: i32) -> (i32, i32) {
    %c0_i32 = arith.constant 0 : i32
    %c0_i32_0 = arith.constant 0 : i32
    return %arg0, %c0_i32 : i32, i32
  }
  func.func @transform_1(%arg0: i32) -> (i32, i32) {
    %c0_i32 = arith.constant 0 : i32
    %c0_i32_0 = arith.constant 0 : i32
    %c0_i32_1 = arith.constant 0 : i32
    return %c0_i32, %c0_i32_0 : i32, i32
  }
  func.func @transform_2(%arg0: i32) -> (i32, i32) {
    %c0_i32 = arith.constant 0 : i32
    %c0_i32_0 = arith.constant 0 : i32
    %c0_i32_1 = arith.constant 0 : i32
    return %c0_i32, %c0_i32_0 : i32, i32
  }
  func.func @transform_3(%arg0: i32) -> (i32, i32) {
    %c0_i32 = arith.constant 0 : i32
    %c0_i32_0 = arith.constant 0 : i32
    %c0_i32_1 = arith.constant 0 : i32
    return %c0_i32, %c0_i32_0 : i32, i32
  }
  func.func @transform_4(%arg0: i32) -> (i32, i32) {
    %c0_i32 = arith.constant 0 : i32
    %c0_i32_0 = arith.constant 0 : i32
    return %arg0, %c0_i32 : i32, i32
  }
}

</mosaic_0001>

<bundles_post_ra>
// kernel: bottleneck_forward.5
= control target key start
LH: loop header
LB: loop body
LE: loop exit
PB: predicated region body
PF: predicated region fallthrough
CT: control target
= control target key end

     0   :  { %s1125_s15 = smov 0   ;;  %s1335_s0 = inlined_call_operand.vmem [shape: bf16[512,64], index: 0, kind: input, shape index: {}]   ;;  %s1336_s1 = inlined_call_operand.vmem [shape: bf16[64,16], index: 1, kind: input, shape index: {}]   ;;  %s1337_s2 = inlined_call_operand.vmem [shape: f32[1,16], index: 2, kind: input, shape index: {}]   ;;  %s1338_s3 = inlined_call_operand.vmem [shape: f32[1,16], index: 3, kind: input, shape index: {}]   ;;  %s1339_s4 = inlined_call_operand.vmem [shape: bf16[512,16], index: 4, kind: output, shape index: {}]  }
   0x1 LB: > { %s883_s16 = sadd.s32 4294967295, %s1098_s15   ;;  %p887_p0 = scmp.ge.s32.totalorder %s1098_s15, 1  ;;  %s1098_s15 = sphi %s1125_s15, %s14_s15  }
   0x2   : > { %p163_p1 = scmp.lt.s32.totalorder %s1098_s15, 3 }
   0x4   : > { %p164_p2 = pnand %p887_p0, %p163_p1 }
   0x5   : > { %v1072_v0 = vld [vmem:[%s1336_s1] sm:$0xff] (!%p164_p2)   ;;  %s888_s19 = sshll.u32 (!%p164_p2), %s883_s16, 5  ;;  %v1073_v1 = vld [vmem:[%s1336_s1 + $0x8] sm:$0xff] (!%p164_p2)   ;;  %v1074_v2 = vld [vmem:[%s1336_s1 + $0x10] sm:$0xff] (!%p164_p2)   ;;  %vm346_vm0 = vcmask (!%p164_p2), 523264   ;;  %vm794_vm1 = vcmask (!%p164_p2), 125952  }
   0x6   : > { %167 = sbr.rel (%p164_p2) target bundleno = 273 (0x111), region = 36  ;;  %p190_p3 = scmp.lt.s32.totalorder (!%p164_p2), %s888_s19, 63  ;;  %1016 = vmatprep.subr.bf16.mxu0 (!%p164_p2), %v1072_v0  ;;  %1056 = vmatprep.subr.bf16.mxu1 (!%p164_p2), %v1072_v0  ;;  %v1075_v3 = vld [vmem:[%s1336_s1 + $0x18] sm:$0xff] (!%p164_p2)   ;;  %v1190_v20 = vld [vmem:[%s1337_s2] ss:$0 sm:$0xff] (!%p164_p2) }
   0x7   : > { %1017 = vmatpush3.bf16.msra.mxu0 (!%p164_p2), %v1072_v0  ;;  %1060 = vmatpush3.bf16.msra.mxu1 (!%p164_p2), %v1072_v0  ;;  %v1195_v22 = vld [vmem:[%s1338_s3] ss:$0 sm:$0xff] (!%p164_p2) }
   0x8   : > { %1018 = vmatprep.subr.bf16.mxu0 (!%p164_p2), %v1073_v1  ;;  %1057 = vmatprep.subr.bf16.mxu1 (!%p164_p2), %v1073_v1 }
   0xb   : > { %1019 = vmatpush3.bf16.msra.mxu0 (!%p164_p2), %v1073_v1  ;;  %1061 = vmatpush3.bf16.msra.mxu1 (!%p164_p2), %v1073_v1 }
   0xc   : > { %1020 = vmatprep.subr.bf16.mxu0 (!%p164_p2), %v1074_v2  ;;  %1058 = vmatprep.subr.bf16.mxu1 (!%p164_p2), %v1074_v2 }
   0xd   : > { %s1341_s19 = smov (!%p190_p3, %s888_s19), 63 }
   0xe   : > { %s889_s24 = sshll.u32 %s1341_s19, 2 }
   0xf   : > { %s1153_s29 = scalar_lea.vmem %s1335_s0, %s889_s24  ;;  %1021 = vmatpush3.bf16.msra.mxu0 %v1074_v2  ;;  %1062 = vmatpush3.bf16.msra.mxu1 %v1074_v2  ;;  %s1216_s10 = scalar_lea.vmem %s1339_s4, %s889_s24 }
  0x10   : > { %v1076_v4 = vld [vmem:[%s1153_s29] sm:$0xff]   ;;  %1022 = vmatprep.subr.bf16.mxu0 %v1075_v3  ;;  %1059 = vmatprep.subr.bf16.mxu1 %v1075_v3  ;;  %v1078_v6 = vld [vmem:[%s1153_s29 + $0x8] sm:$0xff]   ;;  %v1080_v8 = vld [vmem:[%s1153_s29 + $0x10] sm:$0xff]  }
  0x11   : > { %v1077_v5 = vld [vmem:[%s1153_s29 + $0x40] sm:$0xff]   ;;  %1024 = vmatprep.mubr.msk.bf16.mxu0 %vm346_vm0, %v1076_v4  ;;  %v1079_v7 = vld [vmem:[%s1153_s29 + $0x48] sm:$0xff]   ;;  %v1081_v9 = vld [vmem:[%s1153_s29 + $0x50] sm:$0xff]  }
  0x12   : > { %1040 = vmatprep.mubr.msk.bf16.mxu1 %vm346_vm0, %v1077_v5  ;;  %v1082_v10 = vld [vmem:[%s1153_s29 + $0x18] sm:$0xff]   ;;  %v1084_v12 = vld [vmem:[%s1153_s29 + $0x20] sm:$0xff]   ;;  %v1086_v14 = vld [vmem:[%s1153_s29 + $0x28] sm:$0xff]  }
  0x13   : > { %1023 = vmatpush3.bf16.msra.mxu0 %v1075_v3  ;;  %1063 = vmatpush3.bf16.msra.mxu1 %v1075_v3  ;;  %v1083_v11 = vld [vmem:[%s1153_s29 + $0x58] sm:$0xff]   ;;  %v1085_v13 = vld [vmem:[%s1153_s29 + $0x60] sm:$0xff]   ;;  %v1087_v15 = vld [vmem:[%s1153_s29 + $0x68] sm:$0xff]  }
  0x14   : > { %v1088_v16 = vld [vmem:[%s1153_s29 + $0x30] sm:$0xff]   ;;  %v1090_v18 = vld [vmem:[%s1153_s29 + $0x38] sm:$0xff]  }
  0x15   : > { %v1089_v17 = vld [vmem:[%s1153_s29 + $0x70] sm:$0xff]   ;;  %v1091_v19 = vld [vmem:[%s1153_s29 + $0x78] sm:$0xff]  }
  0x16   : > { %1025 = vmatmul.mubr.msk.bf16.vlgmr.msra.gmra.mrb[0].mxu0 %vm346_vm0, %v1078_v6  ;;  %1041 = vmatmul.mubr.msk.bf16.vlgmr.msra.gmra.mrb[0].mxu1 %vm346_vm0, %v1079_v7 }
  0x17   : > { %1028 = vmatprep.mubr.msk.bf16.mxu0 %vm346_vm0, %v1080_v8  ;;  %1044 = vmatprep.mubr.msk.bf16.mxu1 %vm346_vm0, %v1081_v9 }
  0x1e   : > { %1029 = vmatmul.mubr.msk.bf16.gmra.mrb[4].mxu0 %vm346_vm0, %v1082_v10  ;;  %1045 = vmatmul.mubr.msk.bf16.gmra.mrb[4].mxu1 %vm346_vm0, %v1083_v11 }
  0x1f   : > { %1032 = vmatprep.mubr.msk.bf16.mxu0 %vm346_vm0, %v1084_v12  ;;  %1048 = vmatprep.mubr.msk.bf16.mxu1 %vm346_vm0, %v1085_v13 }
  0x26   : > { %1033 = vmatmul.mubr.msk.bf16.gmra.mrb[8].mxu0 %vm346_vm0, %v1086_v14  ;;  %1049 = vmatmul.mubr.msk.bf16.gmra.mrb[8].mxu1 %vm346_vm0, %v1087_v15 }
  0x27   : > { %1036 = vmatprep.mubr.msk.bf16.mxu0 %vm346_vm0, %v1088_v16  ;;  %1052 = vmatprep.mubr.msk.bf16.mxu1 %vm346_vm0, %v1089_v17 }
  0x2e   : > { %1037 = vmatmul.mubr.msk.bf16.gmra.mrb[12].mxu0 %vm346_vm0, %v1090_v18  ;;  %1053 = vmatmul.mubr.msk.bf16.gmra.mrb[12].mxu1 %vm346_vm0, %v1091_v19 }
  0xe9   : > { %v1026_v21 = vpop.f32.mrb[0].mxu0  ;;  %v1042_v23 = vpop.f32.mrb[0].mxu1 }
  0xea   : > { %v565_v24 = vmul.f32 %v1026_v21, %v1190_v20  ;;  %v581_v25 = vmul.f32 %v1042_v23, %v1190_v20  ;;  %v429_v26 = vpop.f32.mrb[1].mxu0  ;;  %v493_v27 = vpop.f32.mrb[1].mxu1 }
  0xeb   : > { %v563_v28 = vmul.f32 %v1190_v20, %v429_v26  ;;  %v579_v29 = vmul.f32 %v1190_v20, %v493_v27  ;;  %v1027_v30 = vpop.f32.mrb[2].mxu0  ;;  %v1043_v31 = vpop.f32.mrb[2].mxu1 }
  0xec   : > { %v604_v32 = vadd.f32 %v1195_v22, %v565_v24  ;;  %v620_v33 = vadd.f32 %v1195_v22, %v581_v25  ;;  %v566_v34 = vmul.f32 %v1027_v30, %v1190_v20  ;;  %v582_v35 = vmul.f32 %v1043_v31, %v1190_v20  ;;  %v432_v36 = vpop.f32.mrb[3].mxu0  ;;  %v496_v37 = vpop.f32.mrb[3].mxu1 }
  0xed   : > { %v602_v38 = vadd.f32 %v1195_v22, %v563_v28  ;;  %v618_v39 = vadd.f32 %v1195_v22, %v579_v29  ;;  %v564_v40 = vmul.f32 %v1190_v20, %v432_v36  ;;  %v580_v41 = vmul.f32 %v1190_v20, %v496_v37 }
  0xee   : > { %v636_v42 = vmax.f32 %v604_v32, 0.0  ;;  %v652_v43 = vmax.f32 %v620_v33, 0.0  ;;  %v605_v44 = vadd.f32 %v1195_v22, %v566_v34  ;;  %v621_v45 = vadd.f32 %v1195_v22, %v582_v35 }
  0xef   : > { %v634_v46 = vmax.f32 %v602_v38, 0.0  ;;  %v650_v47 = vmax.f32 %v618_v39, 0.0  ;;  %v603_v48 = vadd.f32 %v1195_v22, %v564_v40  ;;  %v619_v49 = vadd.f32 %v1195_v22, %v580_v41 }
  0xf0   : > { %v966_v50 = vpack.c.bf16 %v636_v42, %v636_v42  ;;  %v982_v51 = vpack.c.bf16 %v652_v43, %v652_v43  ;;  %v637_v52 = vmax.f32 %v605_v44, 0.0  ;;  %v653_v53 = vmax.f32 %v621_v45, 0.0 }
  0xf1   : > { %v964_v54 = vpack.c.bf16 %v634_v46, %v634_v46  ;;  %v980_v55 = vpack.c.bf16 %v650_v47, %v650_v47  ;;  %v635_v56 = vmax.f32 %v603_v48, 0.0  ;;  %v651_v57 = vmax.f32 %v619_v49, 0.0  ;;  %v1030_v58 = vpop.f32.mrb[4].mxu0  ;;  %v1046_v59 = vpop.f32.mrb[4].mxu1 }
  0xf2   : > { %797 = vst.msk [vmem:[%s1216_s10 + $0x8] sm:$0xf] %vm794_vm1, %v966_v50  ;;  %813 = vst.msk [vmem:[%s1216_s10 + $0x48] sm:$0xf] %vm794_vm1, %v982_v51  ;;  %v967_v60 = vpack.c.bf16 %v637_v52, %v637_v52  ;;  %v983_v61 = vpack.c.bf16 %v653_v53, %v653_v53  ;;  %v569_v62 = vmul.f32 %v1030_v58, %v1190_v20  ;;  %v445_v0 = vpop.f32.mrb[5].mxu0  ;;  %v509_v1 = vpop.f32.mrb[5].mxu1 }
  0xf3   : > { %v585_v63 = vmul.f32 %v1046_v59, %v1190_v20  ;;  %795 = vst.msk [vmem:[%s1216_s10] sm:$0xf] %vm794_vm1, %v964_v54  ;;  %811 = vst.msk [vmem:[%s1216_s10 + $0x40] sm:$0xf] %vm794_vm1, %v980_v55  ;;  %v965_v2 = vpack.c.bf16 %v635_v56, %v635_v56  ;;  %v981_v3 = vpack.c.bf16 %v651_v57, %v651_v57  ;;  %v1031_v6 = vpop.f32.mrb[6].mxu0  ;;  %v1047_v7 = vpop.f32.mrb[6].mxu1 }
  0xf4   : > { %v567_v4 = vmul.f32 %v1190_v20, %v445_v0  ;;  %v583_v5 = vmul.f32 %v1190_v20, %v509_v1  ;;  %798 = vst.msk [vmem:[%s1216_s10 + $0xc] sm:$0xf] %vm794_vm1, %v967_v60  ;;  %814 = vst.msk [vmem:[%s1216_s10 + $0x4c] sm:$0xf] %vm794_vm1, %v983_v61  ;;  %v608_v8 = vadd.f32 %v1195_v22, %v569_v62  ;;  %v448_v12 = vpop.f32.mrb[7].mxu0  ;;  %v512_v13 = vpop.f32.mrb[7].mxu1 }
  0xf5   : > { %v624_v9 = vadd.f32 %v1195_v22, %v585_v63  ;;  %v570_v10 = vmul.f32 %v1031_v6, %v1190_v20  ;;  %v586_v11 = vmul.f32 %v1047_v7, %v1190_v20  ;;  %796 = vst.msk [vmem:[%s1216_s10 + $0x4] sm:$0xf] %vm794_vm1, %v965_v2  ;;  %812 = vst.msk [vmem:[%s1216_s10 + $0x44] sm:$0xf] %vm794_vm1, %v981_v3 }
  0xf6   : > { %v606_v14 = vadd.f32 %v1195_v22, %v567_v4  ;;  %v622_v15 = vadd.f32 %v1195_v22, %v583_v5  ;;  %v568_v16 = vmul.f32 %v1190_v20, %v448_v12  ;;  %v584_v17 = vmul.f32 %v1190_v20, %v512_v13 }
  0xf7   : > { %v640_v18 = vmax.f32 %v608_v8, 0.0  ;;  %v656_v19 = vmax.f32 %v624_v9, 0.0  ;;  %v609_v21 = vadd.f32 %v1195_v22, %v570_v10  ;;  %v625_v23 = vadd.f32 %v1195_v22, %v586_v11 }
  0xf8   : > { %v638_v24 = vmax.f32 %v606_v14, 0.0  ;;  %v654_v25 = vmax.f32 %v622_v15, 0.0  ;;  %v607_v26 = vadd.f32 %v1195_v22, %v568_v16  ;;  %v623_v27 = vadd.f32 %v1195_v22, %v584_v17 }
  0xf9   : > { %v970_v28 = vpack.c.bf16 %v640_v18, %v640_v18  ;;  %v986_v29 = vpack.c.bf16 %v656_v19, %v656_v19  ;;  %v641_v30 = vmax.f32 %v609_v21, 0.0  ;;  %v657_v31 = vmax.f32 %v625_v23, 0.0  ;;  %v1034_v36 = vpop.f32.mrb[8].mxu0  ;;  %v1050_v37 = vpop.f32.mrb[8].mxu1 }
  0xfa   : > { %v968_v32 = vpack.c.bf16 %v638_v24, %v638_v24  ;;  %v984_v33 = vpack.c.bf16 %v654_v25, %v654_v25  ;;  %v639_v34 = vmax.f32 %v607_v26, 0.0  ;;  %v655_v35 = vmax.f32 %v623_v27, 0.0  ;;  %v461_v42 = vpop.f32.mrb[9].mxu0  ;;  %v525_v43 = vpop.f32.mrb[9].mxu1 }
  0xfb   : > { %801 = vst.msk [vmem:[%s1216_s10 + $0x18] sm:$0xf] %vm794_vm1, %v970_v28  ;;  %817 = vst.msk [vmem:[%s1216_s10 + $0x58] sm:$0xf] %vm794_vm1, %v986_v29  ;;  %v971_v38 = vpack.c.bf16 %v641_v30, %v641_v30  ;;  %v987_v39 = vpack.c.bf16 %v657_v31, %v657_v31  ;;  %v573_v40 = vmul.f32 %v1034_v36, %v1190_v20  ;;  %v1035_v48 = vpop.f32.mrb[10].mxu0  ;;  %v1051_v49 = vpop.f32.mrb[10].mxu1 }
  0xfc   : > { %v589_v41 = vmul.f32 %v1050_v37, %v1190_v20  ;;  %799 = vst.msk [vmem:[%s1216_s10 + $0x10] sm:$0xf] %vm794_vm1, %v968_v32  ;;  %815 = vst.msk [vmem:[%s1216_s10 + $0x50] sm:$0xf] %vm794_vm1, %v984_v33  ;;  %v969_v44 = vpack.c.bf16 %v639_v34, %v639_v34  ;;  %v985_v45 = vpack.c.bf16 %v655_v35, %v655_v35  ;;  %v464_v54 = vpop.f32.mrb[11].mxu0  ;;  %v528_v55 = vpop.f32.mrb[11].mxu1 }
  0xfd   : > { %v571_v46 = vmul.f32 %v1190_v20, %v461_v42  ;;  %v587_v47 = vmul.f32 %v1190_v20, %v525_v43  ;;  %802 = vst.msk [vmem:[%s1216_s10 + $0x1c] sm:$0xf] %vm794_vm1, %v971_v38  ;;  %818 = vst.msk [vmem:[%s1216_s10 + $0x5c] sm:$0xf] %vm794_vm1, %v987_v39  ;;  %v612_v50 = vadd.f32 %v1195_v22, %v573_v40 }
  0xfe   : > { %v628_v51 = vadd.f32 %v1195_v22, %v589_v41  ;;  %v574_v52 = vmul.f32 %v1035_v48, %v1190_v20  ;;  %v590_v53 = vmul.f32 %v1051_v49, %v1190_v20  ;;  %800 = vst.msk [vmem:[%s1216_s10 + $0x14] sm:$0xf] %vm794_vm1, %v969_v44  ;;  %816 = vst.msk [vmem:[%s1216_s10 + $0x54] sm:$0xf] %vm794_vm1, %v985_v45 }
  0xff   : > { %v610_v56 = vadd.f32 %v1195_v22, %v571_v46  ;;  %v626_v57 = vadd.f32 %v1195_v22, %v587_v47  ;;  %v572_v58 = vmul.f32 %v1190_v20, %v464_v54  ;;  %v588_v59 = vmul.f32 %v1190_v20, %v528_v55 }
 0x100   : > { %v644_v60 = vmax.f32 %v612_v50, 0.0  ;;  %v660_v61 = vmax.f32 %v628_v51, 0.0  ;;  %v613_v62 = vadd.f32 %v1195_v22, %v574_v52  ;;  %v629_v63 = vadd.f32 %v1195_v22, %v590_v53 }
 0x101   : > { %v642_v0 = vmax.f32 %v610_v56, 0.0  ;;  %v658_v1 = vmax.f32 %v626_v57, 0.0  ;;  %v611_v2 = vadd.f32 %v1195_v22, %v572_v58  ;;  %v627_v3 = vadd.f32 %v1195_v22, %v588_v59  ;;  %v1038_v12 = vpop.f32.mrb[12].mxu0  ;;  %v1054_v13 = vpop.f32.mrb[12].mxu1 }
 0x102   : > { %v974_v4 = vpack.c.bf16 %v644_v60, %v644_v60  ;;  %v990_v5 = vpack.c.bf16 %v660_v61, %v660_v61  ;;  %v645_v6 = vmax.f32 %v613_v62, 0.0  ;;  %v661_v7 = vmax.f32 %v629_v63, 0.0  ;;  %v477_v18 = vpop.f32.mrb[13].mxu0  ;;  %v541_v19 = vpop.f32.mrb[13].mxu1 }
 0x103   : > { %v972_v8 = vpack.c.bf16 %v642_v0, %v642_v0  ;;  %v988_v9 = vpack.c.bf16 %v658_v1, %v658_v1  ;;  %v643_v10 = vmax.f32 %v611_v2, 0.0  ;;  %v659_v11 = vmax.f32 %v627_v3, 0.0  ;;  %v1039_v26 = vpop.f32.mrb[14].mxu0  ;;  %v1055_v27 = vpop.f32.mrb[14].mxu1 }
 0x104   : > { %805 = vst.msk [vmem:[%s1216_s10 + $0x28] sm:$0xf] %vm794_vm1, %v974_v4  ;;  %821 = vst.msk [vmem:[%s1216_s10 + $0x68] sm:$0xf] %vm794_vm1, %v990_v5  ;;  %v975_v14 = vpack.c.bf16 %v645_v6, %v645_v6  ;;  %v991_v15 = vpack.c.bf16 %v661_v7, %v661_v7  ;;  %v577_v16 = vmul.f32 %v1038_v12, %v1190_v20  ;;  %v480_v32 = vpop.f32.mrb[15].mxu0  ;;  %v544_v33 = vpop.f32.mrb[15].mxu1 }
 0x105   : > { %v593_v17 = vmul.f32 %v1054_v13, %v1190_v20  ;;  %803 = vst.msk [vmem:[%s1216_s10 + $0x20] sm:$0xf] %vm794_vm1, %v972_v8  ;;  %819 = vst.msk [vmem:[%s1216_s10 + $0x60] sm:$0xf] %vm794_vm1, %v988_v9  ;;  %v973_v21 = vpack.c.bf16 %v643_v10, %v643_v10  ;;  %v989_v23 = vpack.c.bf16 %v659_v11, %v659_v11 }
 0x106   : > { %v575_v24 = vmul.f32 %v1190_v20, %v477_v18  ;;  %v591_v25 = vmul.f32 %v1190_v20, %v541_v19  ;;  %806 = vst.msk [vmem:[%s1216_s10 + $0x2c] sm:$0xf] %vm794_vm1, %v975_v14  ;;  %822 = vst.msk [vmem:[%s1216_s10 + $0x6c] sm:$0xf] %vm794_vm1, %v991_v15  ;;  %v616_v28 = vadd.f32 %v1195_v22, %v577_v16 }
 0x107   : > { %v632_v29 = vadd.f32 %v1195_v22, %v593_v17  ;;  %v578_v30 = vmul.f32 %v1039_v26, %v1190_v20  ;;  %v594_v31 = vmul.f32 %v1055_v27, %v1190_v20  ;;  %804 = vst.msk [vmem:[%s1216_s10 + $0x24] sm:$0xf] %vm794_vm1, %v973_v21  ;;  %820 = vst.msk [vmem:[%s1216_s10 + $0x64] sm:$0xf] %vm794_vm1, %v989_v23 }
 0x108   : > { %v614_v34 = vadd.f32 %v1195_v22, %v575_v24  ;;  %v630_v35 = vadd.f32 %v1195_v22, %v591_v25  ;;  %v576_v36 = vmul.f32 %v1190_v20, %v480_v32  ;;  %v592_v37 = vmul.f32 %v1190_v20, %v544_v33 }
 0x109   : > { %v648_v38 = vmax.f32 %v616_v28, 0.0  ;;  %v664_v39 = vmax.f32 %v632_v29, 0.0  ;;  %v617_v40 = vadd.f32 %v1195_v22, %v578_v30  ;;  %v633_v41 = vadd.f32 %v1195_v22, %v594_v31 }
 0x10a   : > { %v646_v42 = vmax.f32 %v614_v34, 0.0  ;;  %v662_v43 = vmax.f32 %v630_v35, 0.0  ;;  %v615_v44 = vadd.f32 %v1195_v22, %v576_v36  ;;  %v631_v45 = vadd.f32 %v1195_v22, %v592_v37 }
 0x10b   : > { %v978_v46 = vpack.c.bf16 %v648_v38, %v648_v38  ;;  %v994_v47 = vpack.c.bf16 %v664_v39, %v664_v39  ;;  %v649_v20 = vmax.f32 %v617_v40, 0.0  ;;  %v665_v48 = vmax.f32 %v633_v41, 0.0 }
 0x10c   : > { %v976_v49 = vpack.c.bf16 %v646_v42, %v646_v42  ;;  %v992_v50 = vpack.c.bf16 %v662_v43, %v662_v43  ;;  %v647_v51 = vmax.f32 %v615_v44, 0.0  ;;  %v663_v52 = vmax.f32 %v631_v45, 0.0 }
 0x10d   : > { %809 = vst.msk [vmem:[%s1216_s10 + $0x38] sm:$0xf] %vm794_vm1, %v978_v46  ;;  %825 = vst.msk [vmem:[%s1216_s10 + $0x78] sm:$0xf] %vm794_vm1, %v994_v47  ;;  %v979_v53 = vpack.c.bf16 %v649_v20, %v649_v20  ;;  %v995_v54 = vpack.c.bf16 %v665_v48, %v665_v48 }
 0x10e   : > { %807 = vst.msk [vmem:[%s1216_s10 + $0x30] sm:$0xf] %vm794_vm1, %v976_v49  ;;  %823 = vst.msk [vmem:[%s1216_s10 + $0x70] sm:$0xf] %vm794_vm1, %v992_v50  ;;  %v977_v22 = vpack.c.bf16 %v647_v51, %v647_v51  ;;  %v993_v55 = vpack.c.bf16 %v663_v52, %v663_v52 }
 0x10f   : > { %810 = vst.msk [vmem:[%s1216_s10 + $0x3c] sm:$0xf] %vm794_vm1, %v979_v53  ;;  %826 = vst.msk [vmem:[%s1216_s10 + $0x7c] sm:$0xf] %vm794_vm1, %v995_v54 }
 0x110   : > { %808 = vst.msk [vmem:[%s1216_s10 + $0x34] sm:$0xf] %vm794_vm1, %v977_v22  ;;  %824 = vst.msk [vmem:[%s1216_s10 + $0x74] sm:$0xf] %vm794_vm1, %v993_v55 }
 0x111 PF: > { %s14_s15 = sadd.s32 1, %s1098_s15  }
 0x112   : > { %p11_p4 = scmp.ge.s32.totalorder %s14_s15, 4  }
 0x114   :  { %13 = sbr.rel (!%p11_p4) target bundleno = 1 (0x1), region = 66 }

// kernel: bottleneck_forward.7
= control target key start
LH: loop header
LB: loop body
LE: loop exit
PB: predicated region body
PF: predicated region fallthrough
CT: control target
= control target key end

     0   :  { %vm86_vm0 = vcmask 130048   ;;  %s668_s0 = inlined_call_operand.vmem [shape: bf16[128,16], index: 0, kind: input, shape index: {}]   ;;  %s669_s1 = inlined_call_operand.vmem [shape: bf16[16,64], index: 1, kind: input, shape index: {}]   ;;  %s670_s2 = inlined_call_operand.vmem [shape: f32[1,64], index: 2, kind: input, shape index: {}]   ;;  %s671_s3 = inlined_call_operand.vmem [shape: f32[1,64], index: 3, kind: input, shape index: {}]   ;;  %s672_s4 = inlined_call_operand.vmem [shape: bf16[128,64], index: 4, kind: input, shape index: {}]   ;;  %s673_s5 = inlined_call_operand.hbm [shape: f32[128,64], index: 5, kind: output, shape index: {}]  }
   0x1   :  { %v441_v0 = vld [vmem:[%s669_s1] sm:$0xff]   ;;  %v444_v3 = vld [vmem:[%s668_s0 + $0x8] sm:$0xff]   ;;  %v446_v5 = vld [vmem:[%s668_s0 + $0x10] sm:$0xff]  }
   0x2   :  { %v442_v1 = vld [vmem:[%s668_s0] sm:$0xff]   ;;  %418 = vmatprep.subr.bf16.mxu0 %v441_v0  ;;  %436 = vmatprep.subr.bf16.mxu1 %v441_v0  ;;  %v445_v4 = vld [vmem:[%s668_s0 + $0x28] sm:$0xff]   ;;  %v447_v6 = vld [vmem:[%s668_s0 + $0x30] sm:$0xff]  }
   0x3   :  { %v443_v2 = vld [vmem:[%s668_s0 + $0x20] sm:$0xff]   ;;  %419 = vmatpush3.bf16.msra.mxu0 %v441_v0  ;;  %437 = vmatpush3.bf16.msra.mxu1 %v441_v0 }
   0x4   :  { %420 = vmatprep.mubr.msk.bf16.mxu0 %vm86_vm0, %v442_v1  ;;  %428 = vmatprep.mubr.msk.bf16.mxu1 %vm86_vm0, %v443_v2 }
   0x6   :  { %421 = vmatmul.mubr.msk.bf16.vlgmr.msra.gmra.mrb[0].mxu0 %vm86_vm0, %v444_v3  ;;  %429 = vmatmul.mubr.msk.bf16.vlgmr.msra.gmra.mrb[0].mxu1 %vm86_vm0, %v445_v4 }
   0x7   :  { %424 = vmatprep.mubr.msk.bf16.mxu0 %vm86_vm0, %v446_v5  ;;  %432 = vmatprep.mubr.msk.bf16.mxu1 %vm86_vm0, %v447_v6 }
   0x8   :  { %10 = vsyncpa [#allocation3], 0  ;;  %v448_v7 = vld [vmem:[%s668_s0 + $0x18] sm:$0xff]   ;;  %v402_v9 = vld [vmem:[%s672_s4 + $0x8] sm:$0xff]   ;;  %vm318_vm1 = vcmask 523264  }
   0x9   :  { %v449_v8 = vld [vmem:[%s668_s0 + $0x38] sm:$0xff]   ;;  %v406_v10 = vld [vmem:[%s672_s4 + $0x28] sm:$0xff]   ;;  %v371_v11 = vld [vmem:[%s672_s4] sm:$0xff]   ;;  %v376_v14 = vunpack.c.l.bf16 %v402_v9  ;;  %v377_v22 = vunpack.c.h.bf16 %v402_v9 }
   0xa   :  { %v405_v12 = vld [vmem:[%s672_s4 + $0x20] sm:$0xff]   ;;  %v557_v13 = vld [vmem:[%s672_s4 + $0x18] sm:$0xff]   ;;  %v567_v16 = vld [vmem:[%s672_s4 + $0x10] sm:$0xff]   ;;  %v392_v19 = vunpack.c.l.bf16 %v406_v10  ;;  %v372_v20 = vunpack.c.l.bf16 %v371_v11  ;;  %v393_v23 = vunpack.c.h.bf16 %v406_v10  ;;  %v373_v24 = vunpack.c.h.bf16 %v371_v11 }
   0xb   :  { %v562_v15 = vld [vmem:[%s672_s4 + $0x38] sm:$0xff]   ;;  %v572_v17 = vld [vmem:[%s672_s4 + $0x30] sm:$0xff]   ;;  %v577_v18 = vld [vmem:[%s670_s2] ss:$0 sm:$0xff]  ;;  %v388_v21 = vunpack.c.l.bf16 %v405_v12  ;;  %v389_v25 = vunpack.c.h.bf16 %v405_v12  ;;  %v384_v29 = vunpack.c.l.bf16 %v557_v13  ;;  %v380_v31 = vunpack.c.l.bf16 %v567_v16  ;;  %s474_s2 = smov [#allocation2]  }
   0xc   :  { %v582_v27 = vld [vmem:[%s671_s3] ss:$0 sm:$0xff]  ;;  %v400_v30 = vunpack.c.l.bf16 %v562_v15  ;;  %v396_v32 = vunpack.c.l.bf16 %v572_v17  ;;  %v385_v37 = vunpack.c.h.bf16 %v557_v13  ;;  %v401_v38 = vunpack.c.h.bf16 %v562_v15  ;;  %s340_s3 = sshll.u32 %s474_s2, 4  ;;  %s341_s3 = int_to_ptr.vmem [resolvable:$true] %s340_s3 }
   0xd   :  { %v381_v43 = vunpack.c.h.bf16 %v567_v16  ;;  %v397_v44 = vunpack.c.h.bf16 %v572_v17  ;;  %s450_s4 = scalar_lea.vmem %s341_s3, 2048  ;;  %p455_p1 = scmp.lt.s32.totalorder %s341_s3, %s341_s3 }
   0xe   :  { %425 = vmatmul.mubr.msk.bf16.gmra.mrb[4].mxu0 %vm86_vm0, %v448_v7  ;;  %433 = vmatmul.mubr.msk.bf16.gmra.mrb[4].mxu1 %vm86_vm0, %v449_v8  ;;  %p451_p0 = scmp.ne.s32.totalorder %s341_s3, %s450_s4  ;;  %p456_p2 = scmp.lt.s32.totalorder %s450_s4, %s450_s4 }
  0x10   :  { %p457_p3 = por %p456_p2, %p455_p1 }
  0x12   :  { %p458_p4 = pnand %p457_p3, %p451_p0 }
  0xd9   :  { %v422_v26 = vpop.f32.mrb[0].mxu0  ;;  %v430_v28 = vpop.f32.mrb[0].mxu1 }
  0xda   :  { %v217_v33 = vmul.f32 %v422_v26, %v577_v18  ;;  %v225_v34 = vmul.f32 %v430_v28, %v577_v18  ;;  %v145_v35 = vpop.f32.mrb[1].mxu0  ;;  %v177_v36 = vpop.f32.mrb[1].mxu1 }
  0xdb   :  { %v215_v39 = vmul.f32 %v577_v18, %v145_v35  ;;  %v223_v40 = vmul.f32 %v577_v18, %v177_v36  ;;  %v423_v41 = vpop.f32.mrb[2].mxu0  ;;  %v431_v42 = vpop.f32.mrb[2].mxu1 }
  0xdc   :  { %v240_v45 = vadd.f32 %v582_v27, %v217_v33  ;;  %v248_v46 = vadd.f32 %v582_v27, %v225_v34  ;;  %v218_v47 = vmul.f32 %v423_v41, %v577_v18  ;;  %v226_v48 = vmul.f32 %v431_v42, %v577_v18  ;;  %v148_v49 = vpop.f32.mrb[3].mxu0  ;;  %v180_v50 = vpop.f32.mrb[3].mxu1 }
  0xdd   :  { %v238_v51 = vadd.f32 %v582_v27, %v215_v39  ;;  %v246_v52 = vadd.f32 %v582_v27, %v223_v40  ;;  %v216_v53 = vmul.f32 %v577_v18, %v148_v49  ;;  %v224_v54 = vmul.f32 %v577_v18, %v180_v50 }
  0xde   :  { %v288_v55 = vadd.f32 %v376_v14, %v240_v45  ;;  %v296_v56 = vadd.f32 %v392_v19, %v248_v46  ;;  %v241_v57 = vadd.f32 %v582_v27, %v218_v47  ;;  %v249_v58 = vadd.f32 %v582_v27, %v226_v48 }
  0xdf   :  { %v286_v59 = vadd.f32 %v372_v20, %v238_v51  ;;  %v294_v60 = vadd.f32 %v388_v21, %v246_v52  ;;  %v239_v61 = vadd.f32 %v582_v27, %v216_v53  ;;  %v247_v62 = vadd.f32 %v582_v27, %v224_v54 }
  0xe0   :  { %v304_v63 = vmax.f32 %v288_v55, 0.0  ;;  %v312_v0 = vmax.f32 %v296_v56, 0.0  ;;  %v289_v1 = vadd.f32 %v377_v22, %v241_v57  ;;  %v297_v2 = vadd.f32 %v393_v23, %v249_v58 }
  0xe1   :  { %v302_v3 = vmax.f32 %v286_v59, 0.0  ;;  %v310_v4 = vmax.f32 %v294_v60, 0.0  ;;  %v287_v5 = vadd.f32 %v373_v24, %v239_v61  ;;  %v295_v6 = vadd.f32 %v389_v25, %v247_v62  ;;  %v426_v7 = vpop.f32.mrb[4].mxu0  ;;  %v434_v8 = vpop.f32.mrb[4].mxu1 }
  0xe2   :  { %321 = vst.msk [vmem:[#allocation2 + $0x10] sm:$0xff] %vm318_vm1, %v304_v63  ;;  %329 = vst.msk [vmem:[#allocation2 + $0x50] sm:$0xff] %vm318_vm1, %v312_v0  ;;  %v305_v9 = vmax.f32 %v289_v1, 0.0  ;;  %v313_v10 = vmax.f32 %v297_v2, 0.0  ;;  %v221_v11 = vmul.f32 %v426_v7, %v577_v18  ;;  %v229_v12 = vmul.f32 %v434_v8, %v577_v18  ;;  %v161_v14 = vpop.f32.mrb[5].mxu0  ;;  %v193_v19 = vpop.f32.mrb[5].mxu1 }
  0xe3   :  { %319 = vst.msk [vmem:[#allocation2] sm:$0xff] %vm318_vm1, %v302_v3  ;;  %327 = vst.msk [vmem:[#allocation2 + $0x40] sm:$0xff] %vm318_vm1, %v310_v4  ;;  %v303_v20 = vmax.f32 %v287_v5, 0.0  ;;  %v311_v21 = vmax.f32 %v295_v6, 0.0  ;;  %v219_v22 = vmul.f32 %v577_v18, %v161_v14  ;;  %v227_v23 = vmul.f32 %v577_v18, %v193_v19  ;;  %v427_v24 = vpop.f32.mrb[6].mxu0  ;;  %v435_v25 = vpop.f32.mrb[6].mxu1 }
  0xe4   :  { %322 = vst.msk [vmem:[#allocation2 + $0x18] sm:$0xff] %vm318_vm1, %v305_v9  ;;  %330 = vst.msk [vmem:[#allocation2 + $0x58] sm:$0xff] %vm318_vm1, %v313_v10  ;;  %v244_v26 = vadd.f32 %v582_v27, %v221_v11  ;;  %v252_v28 = vadd.f32 %v582_v27, %v229_v12  ;;  %v222_v33 = vmul.f32 %v427_v24, %v577_v18  ;;  %v164_v35 = vpop.f32.mrb[7].mxu0  ;;  %v196_v36 = vpop.f32.mrb[7].mxu1 }
  0xe5   :  { %v230_v34 = vmul.f32 %v435_v25, %v577_v18  ;;  %320 = vst.msk [vmem:[#allocation2 + $0x8] sm:$0xff] %vm318_vm1, %v303_v20  ;;  %328 = vst.msk [vmem:[#allocation2 + $0x48] sm:$0xff] %vm318_vm1, %v311_v21  ;;  %v242_v39 = vadd.f32 %v582_v27, %v219_v22  ;;  %v250_v40 = vadd.f32 %v582_v27, %v227_v23 }
  0xe6   :  { %v220_v41 = vmul.f32 %v577_v18, %v164_v35  ;;  %v228_v42 = vmul.f32 %v577_v18, %v196_v36  ;;  %v292_v45 = vadd.f32 %v384_v29, %v244_v26  ;;  %v300_v46 = vadd.f32 %v400_v30, %v252_v28 }
  0xe7   :  { %v245_v47 = vadd.f32 %v582_v27, %v222_v33  ;;  %v253_v48 = vadd.f32 %v582_v27, %v230_v34  ;;  %v290_v49 = vadd.f32 %v380_v31, %v242_v39  ;;  %v298_v50 = vadd.f32 %v396_v32, %v250_v40 }
  0xe8   :  { %v243_v51 = vadd.f32 %v582_v27, %v220_v41  ;;  %v251_v18 = vadd.f32 %v582_v27, %v228_v42  ;;  %v308_v29 = vmax.f32 %v292_v45, 0.0  ;;  %v316_v52 = vmax.f32 %v300_v46, 0.0 }
  0xe9   :  { %v293_v30 = vadd.f32 %v385_v37, %v245_v47  ;;  %v301_v53 = vadd.f32 %v401_v38, %v253_v48  ;;  %v306_v54 = vmax.f32 %v290_v49, 0.0  ;;  %v314_v55 = vmax.f32 %v298_v50, 0.0 }
  0xea   :  { %v291_v31 = vadd.f32 %v381_v43, %v243_v51  ;;  %v299_v32 = vadd.f32 %v397_v44, %v251_v18  ;;  %325 = vst.msk [vmem:[#allocation2 + $0x30] sm:$0xff] %vm318_vm1, %v308_v29  ;;  %333 = vst.msk [vmem:[#allocation2 + $0x70] sm:$0xff] %vm318_vm1, %v316_v52 }
  0xeb   :  { %v309_v27 = vmax.f32 %v293_v30, 0.0  ;;  %v317_v56 = vmax.f32 %v301_v53, 0.0  ;;  %323 = vst.msk [vmem:[#allocation2 + $0x20] sm:$0xff] %vm318_vm1, %v306_v54  ;;  %331 = vst.msk [vmem:[#allocation2 + $0x60] sm:$0xff] %vm318_vm1, %v314_v55 }
  0xec   :  { %v307_v13 = vmax.f32 %v291_v31, 0.0  ;;  %v315_v15 = vmax.f32 %v299_v32, 0.0 }
  0xed   :  { %326 = vst.msk [vmem:[#allocation2 + $0x38] sm:$0xff] %vm318_vm1, %v309_v27  ;;  %334 = vst.msk [vmem:[#allocation2 + $0x78] sm:$0xff] %vm318_vm1, %v317_v56 }
  0xee   :  { %324 = vst.msk [vmem:[#allocation2 + $0x28] sm:$0xff] %vm318_vm1, %v307_v13  ;;  %332 = vst.msk [vmem:[#allocation2 + $0x68] sm:$0xff] %vm318_vm1, %v315_v15 }
  0xef   :  { %461 = shalt.err (!%p458_p4)
}
  0xf0   :  { %s462_s30 = scalar_lea.hbm %s673_s5, 2048 }
  0xf1   :  { %p463_p5 = scmp.ne.s32.totalorder %s673_s5, %s462_s30  ;;  %p466_p6 = scmp.lt.u32.totalorder %s462_s30, %s673_s5 }
  0xf3   :  { %p468_p7 = pnand %p466_p6, %p463_p5 }
  0xf5   :  { %471 = shalt.err (!%p468_p7)
}
  0xf6   :  { %s475_s10 = smov 128   ;;  %s476_s11 = smov 8  }
  0xf7   :  { %346 = dma.vmem_to_hbm [thread:$0]  %s341_s3, 2048, %s673_s5, [#allocation3], %s475_s10, %s475_s10, %s476_s11  }
  0xf8   :  { %472 = dma.done.wait [#allocation3], 2048  }
  0xf9   :  { %473 = vsyncadd [#allocation3], 4294965248 }
  0xfa   :  { %350 = vsyncpa [#allocation3], 1 }

// kernel: bottleneck_forward.4
= control target key start
LH: loop header
LB: loop body
LE: loop exit
PB: predicated region body
PF: predicated region fallthrough
CT: control target
= control target key end

     0   :  { %vm106_vm0 = vcmask 523264   ;;  %vm338_vm1 = vcmask 519168   ;;  %s644_s1 = inlined_call_operand.vmem [shape: bf16[64,64], index: 1, kind: input, shape index: {}]   ;;  %s645_s0 = inlined_call_operand.vmem [shape: bf16[128,64], index: 0, kind: input, shape index: {}]   ;;  %s646_s2 = inlined_call_operand.vmem [shape: f32[1,64], index: 2, kind: input, shape index: {}]   ;;  %s647_s3 = inlined_call_operand.vmem [shape: f32[1,64], index: 3, kind: input, shape index: {}]   ;;  %s648_s4 = inlined_call_operand.vmem [shape: bf16[128,64], index: 4, kind: output, shape index: {}]  }
   0x1   :  { %v457_v0 = vld [vmem:[%s644_s1] sm:$0xff]   ;;  %v458_v1 = vld [vmem:[%s644_s1 + $0x8] sm:$0xff]   ;;  %v459_v2 = vld [vmem:[%s644_s1 + $0x10] sm:$0xff]  }
   0x2   :  { %425 = vmatprep.subr.bf16.mxu0 %v457_v0  ;;  %449 = vmatprep.subr.bf16.mxu1 %v457_v0  ;;  %v461_v3 = vld [vmem:[%s645_s0] sm:$0xff]   ;;  %v460_v5 = vld [vmem:[%s644_s1 + $0x18] sm:$0xff]   ;;  %v463_v6 = vld [vmem:[%s645_s0 + $0x8] sm:$0xff]  }
   0x3   :  { %426 = vmatpush3.bf16.msra.mxu0 %v457_v0  ;;  %453 = vmatpush3.bf16.msra.mxu1 %v457_v0  ;;  %v462_v4 = vld [vmem:[%s645_s0 + $0x20] sm:$0xff]   ;;  %v464_v7 = vld [vmem:[%s645_s0 + $0x28] sm:$0xff]   ;;  %v465_v8 = vld [vmem:[%s645_s0 + $0x10] sm:$0xff]  }
   0x4   :  { %427 = vmatprep.subr.bf16.mxu0 %v458_v1  ;;  %450 = vmatprep.subr.bf16.mxu1 %v458_v1  ;;  %v466_v9 = vld [vmem:[%s645_s0 + $0x30] sm:$0xff]   ;;  %v467_v10 = vld [vmem:[%s645_s0 + $0x18] sm:$0xff]   ;;  %v541_v12 = vld [vmem:[%s646_s2] ss:$0 sm:$0xff] }
   0x5   :  { %433 = vmatprep.mubr.msk.bf16.mxu0 %vm106_vm0, %v461_v3  ;;  %441 = vmatprep.mubr.msk.bf16.mxu1 %vm106_vm0, %v462_v4  ;;  %v468_v11 = vld [vmem:[%s645_s0 + $0x38] sm:$0xff]   ;;  %v546_v14 = vld [vmem:[%s647_s3] ss:$0 sm:$0xff] }
   0x7   :  { %428 = vmatpush3.bf16.msra.mxu0 %v458_v1  ;;  %454 = vmatpush3.bf16.msra.mxu1 %v458_v1 }
   0x8   :  { %429 = vmatprep.subr.bf16.mxu0 %v459_v2  ;;  %451 = vmatprep.subr.bf16.mxu1 %v459_v2 }
   0xb   :  { %430 = vmatpush3.bf16.msra.mxu0 %v459_v2  ;;  %455 = vmatpush3.bf16.msra.mxu1 %v459_v2 }
   0xc   :  { %431 = vmatprep.subr.bf16.mxu0 %v460_v5  ;;  %452 = vmatprep.subr.bf16.mxu1 %v460_v5 }
   0xf   :  { %432 = vmatpush3.bf16.msra.mxu0 %v460_v5  ;;  %456 = vmatpush3.bf16.msra.mxu1 %v460_v5 }
  0x12   :  { %434 = vmatmul.mubr.msk.bf16.vlgmr.msra.gmra.mrb[0].mxu0 %vm106_vm0, %v463_v6  ;;  %442 = vmatmul.mubr.msk.bf16.vlgmr.msra.gmra.mrb[0].mxu1 %vm106_vm0, %v464_v7 }
  0x13   :  { %437 = vmatprep.mubr.msk.bf16.mxu0 %vm106_vm0, %v465_v8  ;;  %445 = vmatprep.mubr.msk.bf16.mxu1 %vm106_vm0, %v466_v9 }
  0x1a   :  { %438 = vmatmul.mubr.msk.bf16.gmra.mrb[4].mxu0 %vm106_vm0, %v467_v10  ;;  %446 = vmatmul.mubr.msk.bf16.gmra.mrb[4].mxu1 %vm106_vm0, %v468_v11 }
  0xe5   :  { %v435_v13 = vpop.f32.mrb[0].mxu0  ;;  %v443_v15 = vpop.f32.mrb[0].mxu1 }
  0xe6   :  { %v237_v16 = vmul.f32 %v435_v13, %v541_v12  ;;  %v245_v17 = vmul.f32 %v443_v15, %v541_v12  ;;  %v165_v18 = vpop.f32.mrb[1].mxu0  ;;  %v197_v19 = vpop.f32.mrb[1].mxu1 }
  0xe7   :  { %v235_v20 = vmul.f32 %v541_v12, %v165_v18  ;;  %v243_v21 = vmul.f32 %v541_v12, %v197_v19  ;;  %v436_v22 = vpop.f32.mrb[2].mxu0  ;;  %v444_v23 = vpop.f32.mrb[2].mxu1 }
  0xe8   :  { %v260_v24 = vadd.f32 %v546_v14, %v237_v16  ;;  %v268_v25 = vadd.f32 %v546_v14, %v245_v17  ;;  %v238_v26 = vmul.f32 %v436_v22, %v541_v12  ;;  %v246_v27 = vmul.f32 %v444_v23, %v541_v12  ;;  %v168_v28 = vpop.f32.mrb[3].mxu0  ;;  %v200_v29 = vpop.f32.mrb[3].mxu1 }
  0xe9   :  { %v258_v30 = vadd.f32 %v546_v14, %v235_v20  ;;  %v266_v31 = vadd.f32 %v546_v14, %v243_v21  ;;  %v236_v32 = vmul.f32 %v541_v12, %v168_v28  ;;  %v244_v33 = vmul.f32 %v541_v12, %v200_v29 }
  0xea   :  { %v399_v34 = vpack.c.bf16 %v260_v24, %v260_v24  ;;  %v407_v35 = vpack.c.bf16 %v268_v25, %v268_v25  ;;  %v261_v36 = vadd.f32 %v546_v14, %v238_v26  ;;  %v269_v37 = vadd.f32 %v546_v14, %v246_v27 }
  0xeb   :  { %v397_v38 = vpack.c.bf16 %v258_v30, %v258_v30  ;;  %v405_v39 = vpack.c.bf16 %v266_v31, %v266_v31  ;;  %v259_v40 = vadd.f32 %v546_v14, %v236_v32  ;;  %v267_v41 = vadd.f32 %v546_v14, %v244_v33 }
  0xec   :  { %341 = vst.msk [vmem:[%s648_s4 + $0x8] sm:$0xf] %vm338_vm1, %v399_v34  ;;  %349 = vst.msk [vmem:[%s648_s4 + $0x28] sm:$0xf] %vm338_vm1, %v407_v35  ;;  %v400_v42 = vpack.c.bf16 %v261_v36, %v261_v36  ;;  %v408_v43 = vpack.c.bf16 %v269_v37, %v269_v37 }
  0xed   :  { %339 = vst.msk [vmem:[%s648_s4] sm:$0xf] %vm338_vm1, %v397_v38  ;;  %347 = vst.msk [vmem:[%s648_s4 + $0x20] sm:$0xf] %vm338_vm1, %v405_v39  ;;  %v398_v44 = vpack.c.bf16 %v259_v40, %v259_v40  ;;  %v406_v45 = vpack.c.bf16 %v267_v41, %v267_v41  ;;  %v439_v46 = vpop.f32.mrb[4].mxu0  ;;  %v447_v47 = vpop.f32.mrb[4].mxu1 }
  0xee   :  { %342 = vst.msk [vmem:[%s648_s4 + $0xc] sm:$0xf] %vm338_vm1, %v400_v42  ;;  %350 = vst.msk [vmem:[%s648_s4 + $0x2c] sm:$0xf] %vm338_vm1, %v408_v43  ;;  %v241_v48 = vmul.f32 %v439_v46, %v541_v12  ;;  %v249_v49 = vmul.f32 %v447_v47, %v541_v12  ;;  %v181_v50 = vpop.f32.mrb[5].mxu0  ;;  %v213_v51 = vpop.f32.mrb[5].mxu1 }
  0xef   :  { %340 = vst.msk [vmem:[%s648_s4 + $0x4] sm:$0xf] %vm338_vm1, %v398_v44  ;;  %348 = vst.msk [vmem:[%s648_s4 + $0x24] sm:$0xf] %vm338_vm1, %v406_v45  ;;  %v239_v52 = vmul.f32 %v541_v12, %v181_v50  ;;  %v247_v53 = vmul.f32 %v541_v12, %v213_v51  ;;  %v440_v54 = vpop.f32.mrb[6].mxu0  ;;  %v448_v55 = vpop.f32.mrb[6].mxu1 }
  0xf0   :  { %v264_v56 = vadd.f32 %v546_v14, %v241_v48  ;;  %v272_v57 = vadd.f32 %v546_v14, %v249_v49  ;;  %v242_v58 = vmul.f32 %v440_v54, %v541_v12  ;;  %v250_v59 = vmul.f32 %v448_v55, %v541_v12  ;;  %v184_v60 = vpop.f32.mrb[7].mxu0  ;;  %v216_v61 = vpop.f32.mrb[7].mxu1 }
  0xf1   :  { %v262_v62 = vadd.f32 %v546_v14, %v239_v52  ;;  %v270_v63 = vadd.f32 %v546_v14, %v247_v53  ;;  %v240_v0 = vmul.f32 %v541_v12, %v184_v60  ;;  %v248_v1 = vmul.f32 %v541_v12, %v216_v61 }
  0xf2   :  { %v403_v2 = vpack.c.bf16 %v264_v56, %v264_v56  ;;  %v411_v3 = vpack.c.bf16 %v272_v57, %v272_v57  ;;  %v265_v4 = vadd.f32 %v546_v14, %v242_v58  ;;  %v273_v5 = vadd.f32 %v546_v14, %v250_v59 }
  0xf3   :  { %v401_v6 = vpack.c.bf16 %v262_v62, %v262_v62  ;;  %v409_v7 = vpack.c.bf16 %v270_v63, %v270_v63  ;;  %v263_v8 = vadd.f32 %v546_v14, %v240_v0  ;;  %v271_v9 = vadd.f32 %v546_v14, %v248_v1 }
  0xf4   :  { %345 = vst.msk [vmem:[%s648_s4 + $0x18] sm:$0xf] %vm338_vm1, %v403_v2  ;;  %353 = vst.msk [vmem:[%s648_s4 + $0x38] sm:$0xf] %vm338_vm1, %v411_v3  ;;  %v404_v10 = vpack.c.bf16 %v265_v4, %v265_v4  ;;  %v412_v11 = vpack.c.bf16 %v273_v5, %v273_v5 }
  0xf5   :  { %343 = vst.msk [vmem:[%s648_s4 + $0x10] sm:$0xf] %vm338_vm1, %v401_v6  ;;  %351 = vst.msk [vmem:[%s648_s4 + $0x30] sm:$0xf] %vm338_vm1, %v409_v7  ;;  %v402_v12 = vpack.c.bf16 %v263_v8, %v263_v8  ;;  %v410_v13 = vpack.c.bf16 %v271_v9, %v271_v9 }
  0xf6   :  { %346 = vst.msk [vmem:[%s648_s4 + $0x1c] sm:$0xf] %vm338_vm1, %v404_v10  ;;  %354 = vst.msk [vmem:[%s648_s4 + $0x3c] sm:$0xf] %vm338_vm1, %v412_v11 }
  0xf7   :  { %344 = vst.msk [vmem:[%s648_s4 + $0x14] sm:$0xf] %vm338_vm1, %v402_v12  ;;  %352 = vst.msk [vmem:[%s648_s4 + $0x34] sm:$0xf] %vm338_vm1, %v410_v13 }

// kernel: bottleneck_forward.6
= control target key start
LH: loop header
LB: loop body
LE: loop exit
PB: predicated region body
PF: predicated region fallthrough
CT: control target
= control target key end

     0   :  { %s1360_s15 = smov 0   ;;  %s1579_s0 = inlined_call_operand.vmem [shape: bf16[2,160,64], index: 0, kind: input, shape index: {}]   ;;  %s1580_s1 = inlined_call_operand.vmem [shape: bf16[4,64,16], index: 1, kind: input, shape index: {}]   ;;  %s1581_s2 = inlined_call_operand.vmem [shape: f32[1,16], index: 2, kind: input, shape index: {}]   ;;  %s1582_s3 = inlined_call_operand.vmem [shape: f32[1,16], index: 3, kind: input, shape index: {}]   ;;  %s1583_s4 = inlined_call_operand.vmem [shape: bf16[2,8,8,16], index: 4, kind: output, shape index: {}]  }
   0x1 LB: > { %s1011_s16 = sadd.s32 4294967295, %s1333_s15   ;;  %p1015_p0 = scmp.ge.s32.totalorder %s1333_s15, 1  ;;  %s1333_s15 = sphi %s1360_s15, %s14_s15  }
   0x2   : > { %p162_p1 = scmp.lt.s32.totalorder %s1333_s15, 3 }
   0x4   : > { %p163_p2 = pnand %p1015_p0, %p162_p1 }
   0x5   : > { %v1300_v0 = vld [vmem:[%s1580_s1 + $0x40] sm:$0xff] (!%p163_p2)   ;;  %p188_p3 = scmp.lt.s32.totalorder (!%p163_p2), %s1011_s16, 1  ;;  %v1302_v2 = vld [vmem:[%s1580_s1 + $0x48] sm:$0xff] (!%p163_p2)   ;;  %v1304_v4 = vld [vmem:[%s1580_s1 + $0x50] sm:$0xff] (!%p163_p2)   ;;  %vm299_vm0 = vcmask (!%p163_p2), 523264   ;;  %vm947_vm2 = vcmask (!%p163_p2), 125952  }
   0x6   : > { %166 = sbr.rel (%p163_p2) target bundleno = 306 (0x132), region = 36  ;;  %v1301_v1 = vld [vmem:[%s1580_s1 + $0x20] sm:$0xff] (!%p163_p2)   ;;  %1155 = vmatprep.subr.bf16.mxu1 (!%p163_p2), %v1300_v0  ;;  %v1303_v3 = vld [vmem:[%s1580_s1 + $0x28] sm:$0xff] (!%p163_p2)   ;;  %v1305_v5 = vld [vmem:[%s1580_s1 + $0x30] sm:$0xff] (!%p163_p2)   ;;  %vm544_vm1 = vsmask.f32 (!%p163_p2), 7424 }
   0x7   : > { %1203 = vmatprep.subr.bf16.mxu0 (!%p163_p2), %v1301_v1  ;;  %1156 = vmatpush3.bf16.msra.mxu1 (!%p163_p2), %v1300_v0  ;;  %v1306_v6 = vld [vmem:[%s1580_s1 + $0x58] sm:$0xff] (!%p163_p2)   ;;  %v1311_v15 = vld [vmem:[%s1580_s1] sm:$0xff] (!%p163_p2)   ;;  %v1315_v27 = vld [vmem:[%s1580_s1 + $0x8] sm:$0xff] (!%p163_p2)  }
   0x8   : > { %1204 = vmatpush3.bf16.msra.mxu0 (!%p163_p2), %v1301_v1  ;;  %1157 = vmatprep.subr.bf16.mxu1 (!%p163_p2), %v1302_v2  ;;  %v1307_v7 = vld [vmem:[%s1580_s1 + $0x38] sm:$0xff] (!%p163_p2)   ;;  %v1312_v17 = vld [vmem:[%s1580_s1 + $0x60] sm:$0xff] (!%p163_p2)   ;;  %v1316_v32 = vld [vmem:[%s1580_s1 + $0x68] sm:$0xff] (!%p163_p2)  }
   0x9   : > { %1205 = vmatprep.subr.bf16.mxu0 (!%p163_p2), %v1303_v3  ;;  %v1319_v42 = vld [vmem:[%s1580_s1 + $0x10] sm:$0xff] (!%p163_p2)   ;;  %v1323_v54 = vld [vmem:[%s1580_s1 + $0x18] sm:$0xff] (!%p163_p2)  }
   0xa   : > { %v1320_v43 = vld [vmem:[%s1580_s1 + $0x70] sm:$0xff] (!%p163_p2)   ;;  %v1325_v55 = vld [vmem:[%s1580_s1 + $0x78] sm:$0xff] (!%p163_p2)  }
   0xb   : > { %1158 = vmatpush3.bf16.msra.mxu1 (!%p163_p2), %v1302_v2 }
   0xc   : > { %1206 = vmatpush3.bf16.msra.mxu0 (!%p163_p2), %v1303_v3  ;;  %1159 = vmatprep.subr.bf16.mxu1 (!%p163_p2), %v1304_v4 }
   0xd   : > { %s1585_s16 = smov (!%p188_p3, %s1011_s16), 1  ;;  %1207 = vmatprep.subr.bf16.mxu0 %v1305_v5 }
   0xe   : > { %s1291_s27 = smul.u32 80, %s1585_s16  ;;  %s1106_s7 = sshll.u32 %s1585_s16, 5 }
   0xf   : > { %1160 = vmatpush3.bf16.msra.mxu1 %v1304_v4  ;;  %s1546_s10 = scalar_lea.vmem %s1583_s4, %s1106_s7 }
  0x10   : > { %s1395_s8 = scalar_lea.vmem %s1579_s0, %s1291_s27  ;;  %1208 = vmatpush3.bf16.msra.mxu0 %v1305_v5  ;;  %1161 = vmatprep.subr.bf16.mxu1 %v1306_v6 }
  0x11   : > { %v1401_v8 = vld [vmem:[%s1395_s8 + $0x8] sm:$0xff]   ;;  %v1404_v9 = vld [vmem:[%s1395_s8] sm:$0xff]   ;;  %v1413_v14 = vld [vmem:[%s1395_s8 + $0x10] sm:$0xff]   ;;  %1209 = vmatprep.subr.bf16.mxu0 %v1307_v7 }
  0x12   : > { %1163 = vmatprep.mubr.msk.bf16.mxu1 %vm299_vm0, %v1401_v8  ;;  %v551_v10 = vshll.u32 %v1401_v8, 16  ;;  %v555_v11 = vshrl.u32 %v1401_v8, 16  ;;  %v545_v12 = vshrl.u32 %v1404_v9, 16  ;;  %v547_v13 = vshll.u32 %v1404_v9, 16  ;;  %v1423_v21 = vld [vmem:[%s1395_s8 + $0x18] sm:$0xff]   ;;  %v1427_v25 = vld [vmem:[%s1395_s8 + $0x20] sm:$0xff]  }
  0x13   : > { %v558_v19 = vshll.u32 %v1413_v14, 16  ;;  %v562_v22 = vshrl.u32 %v1413_v14, 16  ;;  %1162 = vmatpush3.bf16.msra.mxu1 %v1306_v6  ;;  %v565_v26 = vshll.u32 %v1423_v21, 16  ;;  %v569_v31 = vshrl.u32 %v1423_v21, 16  ;;  %v1448_v35 = vld [vmem:[%s1395_s8 + $0x28] sm:$0xff]   ;;  %v1455_v40 = vld [vmem:[%s1395_s8 + $0x30] sm:$0xff]  }
  0x14   : > { %v553_v16 = vrot.slane %v551_v10, 1  ;;  %v549_v18 = vrot.slane %v547_v13, 1  ;;  %1210 = vmatpush3.bf16.msra.mxu0 %v1307_v7  ;;  %1179 = vmatprep.subr.bf16.mxu1 %v1311_v15  ;;  %v572_v34 = vshll.u32 %v1427_v25, 16  ;;  %v576_v36 = vshrl.u32 %v1427_v25, 16  ;;  %v1466_v45 = vld [vmem:[%s1395_s8 + $0x38] sm:$0xff]  }
  0x15   : > { %v560_v24 = vrot.slane %v558_v19, 1  ;;  %1227 = vmatprep.subr.bf16.mxu0 %v1312_v17  ;;  %v567_v33 = vrot.slane %v565_v26, 1  ;;  %v579_v41 = vshll.u32 %v1448_v35, 16  ;;  %v586_v47 = vshll.u32 %v1455_v40, 16  ;;  %v215_v51 = vld [vmem:[%s1395_s8 + $0x40] sm:$0xf] }
  0x16   : > { %v557_v20 = vor.u32 %v555_v11, %v553_v16  ;;  %v550_v23 = vor.u32 %v549_v18, %v545_v12  ;;  %1164 = vmatmul.mubr.msk.bf16.vlgmr.msra.gmra.mrb[0].mxu1 %vm299_vm0, %v1413_v14  ;;  %v574_v39 = vrot.slane %v572_v34, 1  ;;  %v583_v49 = vshrl.u32 %v1448_v35, 16  ;;  %v216_v1 = vld [vmem:[%s1395_s8 + $0x44] sm:$0xf]  ;;  %v1326_v7 = vld [vmem:[%s1395_s8 + $0x48] ss:$0 sps:$4 sm:$0xff]  }
  0x17   : > { %v564_v30 = vor.u32 %v562_v22, %v560_v24  ;;  %1180 = vmatpush3.bf16.msra.mxu1 %v1311_v15  ;;  %1167 = vmatprep.mubr.msk.bf16.mxu1 %vm299_vm0, %v1423_v21  ;;  %v571_v38 = vor.u32 %v569_v31, %v567_v33  ;;  %v581_v46 = vrot.slane %v579_v41, 1  ;;  %v590_v50 = vshrl.u32 %v1455_v40, 16  ;;  %v1536_v22 = vld [vmem:[%s1582_s3] ss:$0 sm:$0xff] }
  0x18   : > { %v554_v28 = vsel %vm544_vm1, %v550_v23, %v553_v16  ;;  %v1435_v29 = vsel %vm544_vm1, %v557_v20, %v560_v24  ;;  %1181 = vmatprep.subr.bf16.mxu1 %v1315_v27  ;;  %v578_v44 = vor.u32 %v576_v36, %v574_v39  ;;  %v593_v53 = vshll.u32 %v1466_v45, 16 }
  0x19   : > { %1211 = vmatprep.mubr.msk.bf16.mxu0 %vm299_vm0, %v554_v28  ;;  %v568_v37 = vsel %vm544_vm1, %v564_v30, %v567_v33  ;;  %v575_v48 = vsel %vm544_vm1, %v571_v38, %v574_v39  ;;  %v588_v56 = vrot.slane %v586_v47, 1  ;;  %v585_v57 = vor.u32 %v583_v49, %v581_v46 }
  0x1a   : > { %1212 = vmatmul.mubr.msk.bf16.vlgmr.msra.gmra.mrb[0].mxu0 %vm299_vm0, %v1435_v29  ;;  %v582_v52 = vsel %vm544_vm1, %v578_v44, %v581_v46  ;;  %v1068_v58 = vcombine.low %v215_v51, %v215_v51  ;;  %v595_v60 = vrot.slane %v593_v53, 1  ;;  %v597_v62 = vshrl.u32 %v1466_v45, 16 }
  0x1b   : > { %1228 = vmatpush3.bf16.msra.mxu0 %v1312_v17  ;;  %1215 = vmatprep.mubr.msk.bf16.mxu0 %vm299_vm0, %v568_v37  ;;  %v592_v59 = vor.u32 %v590_v50, %v588_v56  ;;  %v589_v61 = vsel %vm544_vm1, %v585_v57, %v588_v56  ;;  %v1034_v4 = vcombine.low %v215_v51, %v216_v1  ;;  %v770_v10 = vshll.u32 %v1326_v7, 16  ;;  %v1531_v17 = vld [vmem:[%s1581_s2] ss:$0 sm:$0xff] }
  0x1c   : > { %1229 = vmatprep.subr.bf16.mxu0 %v1316_v32  ;;  %1182 = vmatpush3.bf16.msra.mxu1 %v1315_v27  ;;  %v601_v63 = vshll.u32 %v1068_v58, 16  ;;  %v599_v2 = vor.u32 %v597_v62, %v595_v60 }
  0x1d   : > { %1183 = vmatprep.subr.bf16.mxu1 %v1319_v42  ;;  %v596_v0 = vsel %vm544_vm1, %v592_v59, %v595_v60  ;;  %v762_v6 = vshll.u32 %v1034_v4, 16  ;;  %v772_v13 = vrot.slane %v770_v10, 1 }
  0x1e   : > { %1168 = vmatmul.mubr.msk.bf16.gmra.mrb[4].mxu1 %vm299_vm0, %v1427_v25  ;;  %v603_v3 = vrot.slane %v601_v63, 1 }
  0x1f   : > { %1230 = vmatpush3.bf16.msra.mxu0 %v1316_v32  ;;  %1171 = vmatprep.mubr.msk.bf16.mxu1 %vm299_vm0, %v1448_v35 }
  0x20   : > { %1231 = vmatprep.subr.bf16.mxu0 %v1320_v43  ;;  %1184 = vmatpush3.bf16.msra.mxu1 %v1319_v42  ;;  %v604_v5 = vsel %vm544_vm1, %v599_v2, %v603_v3 }
  0x21   : > { %1185 = vmatprep.subr.bf16.mxu1 %v1323_v54 }
  0x22   : > { %1216 = vmatmul.mubr.msk.bf16.gmra.mrb[4].mxu0 %vm299_vm0, %v575_v48 }
  0x23   : > { %1219 = vmatprep.mubr.msk.bf16.mxu0 %vm299_vm0, %v582_v52  ;;  %1232 = vmatpush3.bf16.msra.mxu0 %v1320_v43 }
  0x24   : > { %1233 = vmatprep.subr.bf16.mxu0 %v1325_v55  ;;  %1186 = vmatpush3.bf16.msra.mxu1 %v1323_v54 }
  0x26   : > { %1172 = vmatmul.mubr.msk.bf16.gmra.mrb[8].mxu1 %vm299_vm0, %v1455_v40 }
  0x27   : > { %1234 = vmatpush3.bf16.msra.mxu0 %v1325_v55  ;;  %1175 = vmatprep.mubr.msk.bf16.mxu1 %vm299_vm0, %v1466_v45 }
  0x2a   : > { %1220 = vmatmul.mubr.msk.bf16.gmra.mrb[8].mxu0 %vm299_vm0, %v589_v61 }
  0x2b   : > { %1223 = vmatprep.mubr.msk.bf16.mxu0 %vm299_vm0, %v596_v0 }
  0x2e   : > { %1176 = vmatmul.mubr.msk.bf16.gmra.mrb[12].mxu1 %vm299_vm0, %v1034_v4 }
  0x2f   : > { %1187 = vmatprep.mubr.msk.bf16.mxu1 %vm299_vm0, %v1404_v9  ;;  %v766_v9 = vshrl.u32 %v1034_v4, 16 }
  0x32   : > { %1224 = vmatmul.mubr.msk.bf16.gmra.mrb[12].mxu0 %vm299_vm0, %v604_v5 }
  0x33   : > { %1235 = vmatprep.mubr.msk.bf16.mxu0 %vm299_vm0, %v1435_v29 }
  0x36   : > { %1188 = vmatmul.mubr.msk.bf16.vlgmr.msra.gmra.mrb[0].mxu1 %vm299_vm0, %v1401_v8  ;;  %v764_v8 = vrot.slane %v762_v6, 1 }
  0x37   : > { %1191 = vmatprep.mubr.msk.bf16.mxu1 %vm299_vm0, %v1413_v14 }
  0x38   : > { %v765_v11 = vsel %vm544_vm1, %v599_v2, %v764_v8  ;;  %v768_v12 = vor.u32 %v766_v9, %v764_v8 }
  0x3a   : > { %1236 = vmatmul.mubr.msk.bf16.vlgmr.msra.gmra.mrb[0].mxu0 %vm299_vm0, %v568_v37  ;;  %v773_v14 = vsel %vm544_vm1, %v768_v12, %v772_v13 }
  0x3b   : > { %1239 = vmatprep.mubr.msk.bf16.mxu0 %vm299_vm0, %v575_v48 }
  0x3e   : > { %1192 = vmatmul.mubr.msk.bf16.gmra.mrb[4].mxu1 %vm299_vm0, %v1423_v21 }
  0x3f   : > { %1195 = vmatprep.mubr.msk.bf16.mxu1 %vm299_vm0, %v1427_v25 }
  0x42   : > { %1240 = vmatmul.mubr.msk.bf16.gmra.mrb[4].mxu0 %vm299_vm0, %v582_v52 }
  0x43   : > { %1243 = vmatprep.mubr.msk.bf16.mxu0 %vm299_vm0, %v589_v61 }
  0x46   : > { %1196 = vmatmul.mubr.msk.bf16.gmra.mrb[8].mxu1 %vm299_vm0, %v1448_v35 }
  0x47   : > { %1199 = vmatprep.mubr.msk.bf16.mxu1 %vm299_vm0, %v1455_v40 }
  0x4a   : > { %1244 = vmatmul.mubr.msk.bf16.gmra.mrb[8].mxu0 %vm299_vm0, %v596_v0 }
  0x4b   : > { %1247 = vmatprep.mubr.msk.bf16.mxu0 %vm299_vm0, %v765_v11 }
  0x4e   : > { %1200 = vmatmul.mubr.msk.bf16.gmra.mrb[12].mxu1 %vm299_vm0, %v1466_v45 }
  0x52   : > { %1248 = vmatmul.mubr.msk.bf16.gmra.mrb[12].mxu0 %vm299_vm0, %v773_v14 }
 0x109   : > { %v1189_v15 = vpop.f32.mrb[0].mxu1 }
 0x10a   : > { %v479_v18 = vpop.f32.mrb[1].mxu1 }
 0x10b   : > { %v1190_v21 = vpop.f32.mrb[2].mxu1 }
 0x10c   : > { %v482_v25 = vpop.f32.mrb[3].mxu1 }
 0x10d   : > { %v1237_v16 = vpop.f32.mrb[0].mxu0 }
 0x10e   : > { %v1251_v19 = vadd.f32 %v1237_v16, %v1189_v15  ;;  %v838_v20 = vpop.f32.mrb[1].mxu0 }
 0x10f   : > { %v1252_v23 = vadd.f32 %v838_v20, %v479_v18  ;;  %v1238_v24 = vpop.f32.mrb[2].mxu0 }
 0x110   : > { %v909_v26 = vmul.f32 %v1251_v19, %v1531_v17  ;;  %v841_v27 = vpop.f32.mrb[3].mxu0 }
 0x111   : > { %v908_v28 = vmul.f32 %v1252_v23, %v1531_v17  ;;  %v1193_v32 = vpop.f32.mrb[4].mxu1 }
 0x112   : > { %v924_v29 = vadd.f32 %v1536_v22, %v909_v26  ;;  %v493_v35 = vpop.f32.mrb[5].mxu1 }
 0x113   : > { %v923_v30 = vadd.f32 %v1536_v22, %v908_v28  ;;  %v1194_v39 = vpop.f32.mrb[6].mxu1 }
 0x114   : > { %v932_v31 = vmax.f32 %v924_v29, 0.0  ;;  %v496_v43 = vpop.f32.mrb[7].mxu1 }
 0x115   : > { %v931_v33 = vmax.f32 %v923_v30, 0.0  ;;  %v1241_v34 = vpop.f32.mrb[4].mxu0 }
 0x116   : > { %v940_v36 = vpack.c.bf16 %v932_v31, %v932_v31  ;;  %v1253_v37 = vadd.f32 %v1241_v34, %v1193_v32  ;;  %v852_v38 = vpop.f32.mrb[5].mxu0 }
 0x117   : > { %v939_v40 = vpack.c.bf16 %v931_v33, %v931_v33  ;;  %v1254_v41 = vadd.f32 %v852_v38, %v493_v35  ;;  %v1242_v42 = vpop.f32.mrb[6].mxu0 }
 0x118   : > { %949 = vst.msk [vmem:[%s1546_s10 + $0x4] sm:$0xf] %vm947_vm2, %v940_v36  ;;  %v911_v44 = vmul.f32 %v1253_v37, %v1531_v17  ;;  %v855_v45 = vpop.f32.mrb[7].mxu0 }
 0x119   : > { %948 = vst.msk [vmem:[%s1546_s10] sm:$0xf] %vm947_vm2, %v939_v40  ;;  %v910_v46 = vmul.f32 %v1254_v41, %v1531_v17  ;;  %v1197_v50 = vpop.f32.mrb[8].mxu1 }
 0x11a   : > { %v926_v47 = vadd.f32 %v1536_v22, %v911_v44  ;;  %v507_v53 = vpop.f32.mrb[9].mxu1 }
 0x11b   : > { %v925_v48 = vadd.f32 %v1536_v22, %v910_v46  ;;  %v1198_v57 = vpop.f32.mrb[10].mxu1 }
 0x11c   : > { %v934_v49 = vmax.f32 %v926_v47, 0.0  ;;  %v510_v61 = vpop.f32.mrb[11].mxu1 }
 0x11d   : > { %v933_v51 = vmax.f32 %v925_v48, 0.0  ;;  %v1245_v52 = vpop.f32.mrb[8].mxu0 }
 0x11e   : > { %v942_v54 = vpack.c.bf16 %v934_v49, %v934_v49  ;;  %v1255_v55 = vadd.f32 %v1245_v52, %v1197_v50  ;;  %v866_v56 = vpop.f32.mrb[9].mxu0 }
 0x11f   : > { %v941_v58 = vpack.c.bf16 %v933_v51, %v933_v51  ;;  %v1256_v59 = vadd.f32 %v866_v56, %v507_v53  ;;  %v1246_v60 = vpop.f32.mrb[10].mxu0 }
 0x120   : > { %951 = vst.msk [vmem:[%s1546_s10 + $0xc] sm:$0xf] %vm947_vm2, %v942_v54  ;;  %v913_v62 = vmul.f32 %v1255_v55, %v1531_v17  ;;  %v869_v63 = vpop.f32.mrb[11].mxu0 }
 0x121   : > { %950 = vst.msk [vmem:[%s1546_s10 + $0x8] sm:$0xf] %vm947_vm2, %v941_v58  ;;  %v912_v0 = vmul.f32 %v1256_v59, %v1531_v17  ;;  %v1201_v4 = vpop.f32.mrb[12].mxu1 }
 0x122   : > { %v928_v1 = vadd.f32 %v1536_v22, %v913_v62  ;;  %v521_v7 = vpop.f32.mrb[13].mxu1 }
 0x123   : > { %v927_v2 = vadd.f32 %v1536_v22, %v912_v0  ;;  %v1202_v11 = vpop.f32.mrb[14].mxu1 }
 0x124   : > { %v936_v3 = vmax.f32 %v928_v1, 0.0  ;;  %v524_v15 = vpop.f32.mrb[15].mxu1 }
 0x125   : > { %v935_v5 = vmax.f32 %v927_v2, 0.0  ;;  %v1249_v6 = vpop.f32.mrb[12].mxu0 }
 0x126   : > { %v944_v8 = vpack.c.bf16 %v936_v3, %v936_v3  ;;  %v1257_v9 = vadd.f32 %v1249_v6, %v1201_v4  ;;  %v880_v10 = vpop.f32.mrb[13].mxu0 }
 0x127   : > { %v943_v12 = vpack.c.bf16 %v935_v5, %v935_v5  ;;  %v1258_v13 = vadd.f32 %v880_v10, %v521_v7  ;;  %v1250_v14 = vpop.f32.mrb[14].mxu0 }
 0x128   : > { %953 = vst.msk [vmem:[%s1546_s10 + $0x14] sm:$0xf] %vm947_vm2, %v944_v8  ;;  %v915_v16 = vmul.f32 %v1257_v9, %v1531_v17  ;;  %v883_v18 = vpop.f32.mrb[15].mxu0 }
 0x129   : > { %952 = vst.msk [vmem:[%s1546_s10 + $0x10] sm:$0xf] %vm947_vm2, %v943_v12  ;;  %v914_v19 = vmul.f32 %v1258_v13, %v1531_v17 }
 0x12a   : > { %v930_v20 = vadd.f32 %v1536_v22, %v915_v16 }
 0x12b   : > { %v929_v21 = vadd.f32 %v1536_v22, %v914_v19 }
 0x12c   : > { %v938_v23 = vmax.f32 %v930_v20, 0.0 }
 0x12d   : > { %v937_v24 = vmax.f32 %v929_v21, 0.0 }
 0x12e   : > { %v946_v25 = vpack.c.bf16 %v938_v23, %v938_v23 }
 0x12f   : > { %v945_v26 = vpack.c.bf16 %v937_v24, %v937_v24 }
 0x130   : > { %955 = vst.msk [vmem:[%s1546_s10 + $0x1c] sm:$0xf] %vm947_vm2, %v946_v25 }
 0x131   : > { %954 = vst.msk [vmem:[%s1546_s10 + $0x18] sm:$0xf] %vm947_vm2, %v945_v26 }
 0x132 PF: > { %s14_s15 = sadd.s32 1, %s1333_s15  }
 0x133   : > { %p11_p4 = scmp.ge.s32.totalorder %s14_s15, 4  }
 0x135   :  { %13 = sbr.rel (!%p11_p4) target bundleno = 1 (0x1), region = 69 }

</bundles_post_ra>
